<compile_context>
chip_gen: v7x
topology: tpu7x:2x2x1
jax: 0.10.0
libtpu: 0.0.40
codegen_flags: <defaults>
</compile_context>

<pallas_src>
import math

import jax
import jax.numpy as jnp
from jax.experimental import pallas as pl
from jax.experimental.pallas import tpu as pltpu

EPS = 1e-10
_VMEM_LIMIT = 48 * 1024 * 1024  # fits v7x's 64 MiB physical VMEM with headroom


def _round_up(x, m):
    return ((x + m - 1) // m) * m


def _full_spec(shape):
    n = len(shape)
    return pl.BlockSpec(shape, lambda *args: (0,) * n)


def _pick_block(n, block_rows):
    """Rows per grid step: multiple of 8, <= block_rows, and >=2 grid steps
    whenever the problem allows it (keeps both v7x TensorCores busy)."""
    n8 = _round_up(max(n, 1), 8)
    cap = max(8, _round_up(block_rows, 8))
    tb = n8 if n8 < 16 else _round_up((n8 + 1) // 2, 8)
    return min(cap, tb)


# ----------------------------- Pallas kernels -----------------------------

def attn_agg_kernel(qm_ref, er_ref, query_ref,
                    w1q_ref, w1e_ref, b1_ref, wc_ref, bc_ref,
                    wa1p_ref, wa2_ref, ba2_ref, wg_ref, bg_ref, out_ref):
    """Shared attention aggregation (_DevModel / _TaskModel / _SocialModel)
    for a block of TB independent rows.

    qm carries q in lanes [0:D] and the neighbor mask in lane D.  The first
    Linear of g_v/g_u is split as q@w1q + er@w1e (no concat); the g_v second
    layer and the first attention layer share one fused matmul against
    W_comb = [w2 | w2@wa1x].  The mask is applied only at the softmax
    (masked neighbors get alpha = 0 either way).  MXU operands are bf16,
    accumulation and elementwise math f32.
    """
    TB, L, Dp1 = qm_ref.shape
    D = Dp1 - 1
    bf16 = jnp.bfloat16

    qm = qm_ref[...]                              # (TB, L, D+1) f32
    mask = qm[:, :, D:]                           # (TB, L, 1)   0/1
    qf = qm.reshape(TB * L, Dp1)
    erf = er_ref[...].reshape(TB * L, D)
    query = query_ref[...]                        # (TB, D)

    # g_v / g_u layer 1: tanh(q@w1q + er@w1e + b1)  (w1q has a zero row for
    # the mask lane, so no slicing of the activation is needed)
    h1 = jnp.tanh(
        jnp.dot(qf.astype(bf16), w1q_ref[...], preferred_element_type=jnp.float32)
        + jnp.dot(erf.astype(bf16), w1e_ref[...], preferred_element_type=jnp.float32)
        + b1_ref[...])                            # (TB*L, D)

    # fused: [x | x@wa1x (+ba1)] in one matmul
    comb = jnp.dot(h1.astype(bf16), wc_ref[...],
                   preferred_element_type=jnp.float32) + bc_ref[...]   # (TB*L, 2D)
    x3 = comb[:, :D].reshape(TB, L, D)            # x_ia / f_jt
    xw3 = comb[:, D:].reshape(TB, L, D)           # x @ wa1x + b2@wa1x + ba1

    # attention logits: relu(x@wa1x + query@wa1p + ba1) . wa2 + ba2
    qp = jnp.dot(query.astype(bf16), wa1p_ref[...],
                 preferred_element_type=jnp.float32)                   # (TB, D)
    a1 = jnp.maximum(xw3 + qp[:, None, :], 0.0)                        # (TB, L, D)
    logits = (jnp.sum(a1 * wa2_ref[...], axis=-1, keepdims=True)
              + ba2_ref[...])                                          # (TB, L, 1)

    # masked softmax; max-subtraction for overflow safety (matches the
    # reference up to the eps term scaling -- benign, documented)
    lmax = jnp.max(logits, axis=1, keepdims=True)
    e = jnp.exp(logits - lmax) * mask
    den = jnp.sum(e, axis=1, keepdims=True) + EPS
    alpha = e * pl.reciprocal(den, approx=True)

    h = jnp.sum(alpha * x3, axis=1)                                    # (TB, D)

    # TODO(synk): (TB, 32) output is lane-sparse; a kron(I4, W) packing would
    # make it dense (review item 10) -- not applied here.
    out_ref[...] = jnp.tanh(
        jnp.dot(h.astype(bf16), wg_ref[...], preferred_element_type=jnp.float32)
        + bg_ref[...])


def rate_pred_kernel(a_ref, z_ref, w1a_ref, w1b_ref, b1_ref,
                     w2_ref, b2_ref, w3_ref, b3_ref, out_ref):
    """Fused rating head for a block of TB rows.

    a_ref rows 0..S-1 are the friend factors y_i (lane D holds the precomputed
    weight 0.5*mask/(sum(mask)+eps)), row S is h_i (lane D = 0.5), remaining
    rows are zero padding (lane D = 0).  One MLP chain over all rows; the
    final r = 0.5*r1 + 0.5*r2 is a single weighted sublane reduce.  The
    z_j @ w1b term is computed once and broadcast over rows.
    """
    TB, SP, Dp1 = a_ref.shape
    D = Dp1 - 1
    bf16 = jnp.bfloat16

    a = a_ref[...]                                # (TB, SP, D+1) f32
    wsel = a[:, :, D:]                            # (TB, SP, 1) combination weights
    af = a.reshape(TB * SP, Dp1)

    zp = jnp.dot(z_ref[...].astype(bf16), w1b_ref[...],
                 preferred_element_type=jnp.float32) + b1_ref[...]     # (TB, D)

    t = jnp.dot(af.astype(bf16), w1a_ref[...],
                preferred_element_type=jnp.float32)                    # (TB*SP, D)
    t = jnp.tanh(t.reshape(TB, SP, D) + zp[:, None, :])
    t = jnp.tanh(jnp.dot(t.reshape(TB * SP, D).astype(bf16), w2_ref[...],
                         preferred_element_type=jnp.float32) + b2_ref[...])

    preds = (jnp.sum(t * w3_ref[...], axis=-1, keepdims=True)
             + b3_ref[...])                                            # (TB*SP, 1)

    # TODO(synk): emit a lane-dense (1, TB) output instead of (TB, 1) if this
    # store ever shows up (v5e vst slot); negligible at these sizes.
    out_ref[...] = jnp.sum(preds.reshape(TB, SP, 1) * wsel, axis=1)    # (TB, 1)


# ----------------------------- wrappers -----------------------------

def attn_aggregate(qm, er, query, params, *, block_rows=512):
    """qm: (N, L, D+1) with the neighbor mask in lane D; er: (N, L, D);
    query: (N, D).  Returns (N, D).  block_rows: sweep 512-1024."""
    N, L, Dp1 = qm.shape
    D = Dp1 - 1
    w1, b1, w2, b2, wa1, ba1, wa2, ba2, wg, bg = params
    f32, bf16 = jnp.float32, jnp.bfloat16

    # weight prep (once per call, tiny): split concats, fuse x/xw matmuls
    w1q = jnp.concatenate([w1[:D], jnp.zeros((1, D), f32)], axis=0)   # mask lane -> 0
    w1e = w1[D:]
    wa1x, wa1p = wa1[:D], wa1[D:]
    wc = jnp.concatenate([w2, w2 @ wa1x], axis=1)                     # (D, 2D)
    bc = jnp.concatenate([b2, b2 @ wa1x + ba1], axis=1)               # (1, 2D)
    weights = (w1q.astype(bf16), w1e.astype(bf16), b1,
               wc.astype(bf16), bc, wa1p.astype(bf16),
               wa2.reshape(1, 1, D), ba2, wg.astype(bf16), bg)

    L_pad = _round_up(L, 8)                   # neighbor axis on sublanes
    TB = _pick_block(N, block_rows)
    N_pad = _round_up(N, TB)
    if L_pad != L:
        qm = jnp.pad(qm, ((0, 0), (0, L_pad - L), (0, 0)))   # mask lane pads to 0
        er = jnp.pad(er, ((0, 0), (0, L_pad - L), (0, 0)))
    if N_pad != N:
        pn = N_pad - N
        qm = jnp.pad(qm, ((0, pn), (0, 0), (0, 0)))
        er = jnp.pad(er, ((0, pn), (0, 0), (0, 0)))
        query = jnp.pad(query, ((0, pn), (0, 0)))

    out = pl.pallas_call(
        attn_agg_kernel,
        out_shape=jax.ShapeDtypeStruct((N_pad, D), jnp.float32),
        grid=(N_pad // TB,),
        in_specs=[pl.BlockSpec((TB, L_pad, Dp1), lambda n: (n, 0, 0)),
                  pl.BlockSpec((TB, L_pad, D), lambda n: (n, 0, 0)),
                  pl.BlockSpec((TB, D), lambda n: (n, 0))]
                 + [_full_spec(w.shape) for w in weights],
        out_specs=pl.BlockSpec((TB, D), lambda n: (n, 0)),
        compiler_params=pltpu.CompilerParams(
            dimension_semantics=("parallel",),
            vmem_limit_bytes=_VMEM_LIMIT),
    )(qm, er, query, *weights)
    return out[:N]


def rate_predict(h_i, z_j, y_i, wsel, params, *, block_rows=512):
    """h_i, z_j: (B, D); y_i: (B, S, D); wsel: (B, S) precomputed weights
    0.5*mask/(sum(mask)+eps).  Returns 0.5*(r1+r2) of shape (B, 1)."""
    B, S, D = y_i.shape
    w1, b1, w2, b2, w3, b3 = params
    f32, bf16 = jnp.float32, jnp.bfloat16

    w1a = jnp.concatenate([w1[:D], jnp.zeros((1, D), f32)], axis=0).astype(bf16)
    w1b = w1[D:].astype(bf16)
    w2b = w2.astype(bf16)
    w3row = w3.reshape(1, D)                  # f32, used as multiply+reduce

    # stack h_i as an extra "friend" row with combination weight 0.5
    SP = _round_up(S + 1, 8)
    rows = jnp.concatenate([y_i, h_i[:, None, :]], axis=1)            # (B, S+1, D)
    sel = jnp.concatenate([wsel, jnp.full((B, 1), 0.5, f32)], axis=1)  # (B, S+1)
    a = jnp.concatenate([rows, sel[:, :, None]], axis=2)              # (B, S+1, D+1)
    if SP != S + 1:
        a = jnp.pad(a, ((0, 0), (0, SP - (S + 1)), (0, 0)))

    TB = _pick_block(B, block_rows)
    B_pad = _round_up(B, TB)
    if B_pad != B:
        pb = B_pad - B
        a = jnp.pad(a, ((0, pb), (0, 0), (0, 0)))
        z_j = jnp.pad(z_j, ((0, pb), (0, 0)))

    weights = (w1a, w1b, b1, w2b, b2, w3row, b3)
    out = pl.pallas_call(
        rate_pred_kernel,
        out_shape=jax.ShapeDtypeStruct((B_pad, 1), jnp.float32),
        grid=(B_pad // TB,),
        in_specs=[pl.BlockSpec((TB, SP, D + 1), lambda n: (n, 0, 0)),
                  pl.BlockSpec((TB, D), lambda n: (n, 0))]
                 + [_full_spec(w.shape) for w in weights],
        out_specs=pl.BlockSpec((TB, 1), lambda n: (n, 0)),
        compiler_params=pltpu.CompilerParams(
            dimension_semantics=("parallel",),
            vmem_limit_bytes=_VMEM_LIMIT),
    )(a, z_j, *weights)
    return out[:B]


# ----------------------------- parameters -----------------------------

def _linear(key, fan_in, fan_out):
    kw, kb = jax.random.split(key)
    bound = 1.0 / math.sqrt(fan_in)
    w = jax.random.uniform(kw, (fan_in, fan_out), jnp.float32, -bound, bound)
    b = jax.random.uniform(kb, (1, fan_out), jnp.float32, -bound, bound)
    return w, b


def make_agg_params(key, D):
    ks = jax.random.split(key, 5)
    w1, b1 = _linear(ks[0], 2 * D, D)    # g_v / g_u layer 1
    w2, b2 = _linear(ks[1], D, D)        # g_v / g_u layer 2
    wa1, ba1 = _linear(ks[2], 2 * D, D)  # attention MLP layer 1
    wa2, ba2 = _linear(ks[3], D, 1)      # attention MLP layer 2
    wg, bg = _linear(ks[4], D, D)        # aggregation Linear
    return (w1, b1, w2, b2, wa1, ba1, wa2, ba2, wg, bg)


def make_rate_pred_params(key, D):
    ks = jax.random.split(key, 3)
    w1, b1 = _linear(ks[0], 2 * D, D)
    w2, b2 = _linear(ks[1], D, D)
    w3, b3 = _linear(ks[2], D, 1)
    return (w1, b1, w2, b2, w3, b3)


# ----------------------------- full forward -----------------------------

def rgprec_forward(params, uids, iids, u_itemdiv_pad, u_avgs,
                   u_user_pad, u_user_item_pad, i_user_pad, i_avgs):
    user_emb = params["user_emb"]
    item_emb = params["item_emb"]
    rate_emb = params["rate_emb"]
    D = user_emb.shape[1]
    B = uids.shape[0]

    # Augment the tables with one "index > 0" column: the gather then carries
    # the neighbor mask in lane D (no separate mask tensor, no [q,er] concat).
    item_aug = jnp.concatenate(
        [item_emb, (jnp.arange(item_emb.shape[0]) > 0).astype(jnp.float32)[:, None]],
        axis=1)
    user_aug = jnp.concatenate(
        [user_emb, (jnp.arange(user_emb.shape[0]) > 0).astype(jnp.float32)[:, None]],
        axis=1)

    # ---- _DevModel (user_model): developer latent factor h_i ----
    h_i = attn_aggregate(item_aug[u_itemdiv_pad[:, :, 0]],
                         rate_emb[u_itemdiv_pad[:, :, 1]],
                         user_emb[uids], params["user_model"])

    # ---- _TaskModel (item_model): task latent factor z_j ----
    z_j = attn_aggregate(user_aug[i_user_pad[:, :, 0]],
                         rate_emb[i_user_pad[:, :, 1]],
                         item_emb[iids], params["item_model"])

    # ---- _SocialModel: per-friend factor y_i ----
    _, S, Ls, _ = u_user_item_pad.shape
    qm_s = item_aug[u_user_item_pad[:, :, :, 0]].reshape(B * S, Ls, D + 1)
    er_s = rate_emb[u_user_item_pad[:, :, :, 1]].reshape(B * S, Ls, D)
    friend = user_emb[u_user_pad[:, :, 0]].reshape(B * S, D)
    y_i = attn_aggregate(qm_s, er_s, friend,
                         params["social_model"]).reshape(B, S, D)
    # TODO(synk): the three aggregations could share one pallas_call (rows
    # stacked, weight set selected per block via scalar prefetch).

    # ---- fused rating prediction ----
    smask = u_user_pad[:, :, 1].astype(jnp.float32)                   # (B, S)
    wsel = 0.5 * smask / (jnp.sum(smask, axis=1, keepdims=True) + EPS)
    r = rate_predict(h_i, z_j, y_i, wsel, params["rate_pred"])
    return r + 0.5 * (u_avgs + i_avgs)[:, None]


# ----------------------------- pure-JAX reference -----------------------------

def _agg_ref(q, er, mask, query, p):
    w1, b1, w2, b2, wa1, ba1, wa2, ba2, wg, bg = p
    x = jnp.tanh(jnp.concatenate([q, er], -1) @ w1 + b1) @ w2 + b2
    pi = mask * query
    a = jnp.maximum(jnp.concatenate([x, pi], -1) @ wa1 + ba1, 0.0) @ wa2 + ba2
    a = jnp.exp(a) * mask
    a = a / (jnp.sum(a, axis=1, keepdims=True) + EPS)
    h = jnp.sum(a * x, axis=1)
    return jnp.tanh(h @ wg + bg)


def _rp_ref(a, b, p):
    w1, b1, w2, b2, w3, b3 = p
    h = jnp.tanh(jnp.concatenate([a, b], -1) @ w1 + b1)
    h = jnp.tanh(h @ w2 + b2)
    return h @ w3 + b3


def rgprec_forward_ref(params, uids, iids, u_itemdiv_pad, u_avgs,
                       u_user_pad, u_user_item_pad, i_user_pad, i_avgs):
    user_emb, item_emb, rate_emb = params["user_emb"], params["item_emb"], params["rate_emb"]
    D = user_emb.shape[1]
    B = uids.shape[0]
    ui = u_itemdiv_pad[:, :, 0]
    h_i = _agg_ref(item_emb[ui], rate_emb[u_itemdiv_pad[:, :, 1]],
                   (ui > 0).astype(jnp.float32)[:, :, None],
                   user_emb[uids][:, None, :], params["user_model"])
    iu = i_user_pad[:, :, 0]
    z_j = _agg_ref(user_emb[iu], rate_emb[i_user_pad[:, :, 1]],
                   (iu > 0).astype(jnp.float32)[:, :, None],
                   item_emb[iids][:, None, :], params["item_model"])
    _, S, Ls, _ = u_user_item_pad.shape
    si = u_user_item_pad[:, :, :, 0]
    y_i = _agg_ref(item_emb[si].reshape(B * S, Ls, D),
                   rate_emb[u_user_item_pad[:, :, :, 1]].reshape(B * S, Ls, D),
                   (si > 0).astype(jnp.float32).reshape(B * S, Ls, 1),
                   user_emb[u_user_pad[:, :, 0]].reshape(B * S, 1, D),
                   params["social_model"]).reshape(B, S, D)
    rp = params["rate_pred"]
    r1 = _rp_ref(h_i, z_j, rp)
    z_exp = jnp.broadcast_to(z_j[:, None, :], (B, S, D)).reshape(B * S, D)
    preds = _rp_ref(y_i.reshape(B * S, D), z_exp, rp).reshape(B, S, 1)
    mask = u_user_pad[:, :, 1:2].astype(jnp.float32)
    r2 = jnp.sum(preds * mask, axis=1) / (jnp.sum(mask, axis=1) + EPS)
    return 0.5 * (r1 + r2) + 0.5 * (u_avgs[:, None] + i_avgs[:, None])


# ----------------------------- main -----------------------------

if __name__ == "__main__":
    num_users, num_items, num_rate = 20, 30, 6
    D, B, Lu, S, Ls, Li = 32, 2, 8, 4, 8, 8

    keys = jax.random.split(jax.random.PRNGKey(0), 20)

    user_emb = (0.1 * jax.random.normal(keys[0], (num_users, D), jnp.float32)).at[0].set(0.0)
    item_emb = (0.1 * jax.random.normal(keys[1], (num_items, D), jnp.float32)).at[0].set(0.0)
    rate_emb = (0.1 * jax.random.normal(keys[2], (num_rate, D), jnp.float32)).at[0].set(0.0)

    params = {
        "user_emb": user_emb,
        "item_emb": item_emb,
        "rate_emb": rate_emb,
        "user_model": make_agg_params(keys[3], D),
        "item_model": make_agg_params(keys[4], D),
        "social_model": make_agg_params(keys[5], D),
        "rate_pred": make_rate_pred_params(keys[6], D),
    }
    # TODO(synk): sim_dim embedding and the per-submodel combine_mlp are declared
    # in __init__ but never used in the reference forward pass, so they are omitted.

    uids = jax.random.randint(keys[7], (B,), 1, num_users)
    iids = jax.random.randint(keys[8], (B,), 1, num_items)
    u_itemdiv_pad = jnp.stack(
        [jax.random.randint(keys[9], (B, Lu), 0, num_items),
         jax.random.randint(keys[10], (B, Lu), 1, num_rate)], axis=-1)
    u_user_pad = jnp.stack(
        [jax.random.randint(keys[11], (B, S), 0, num_users),
         jax.random.randint(keys[12], (B, S), 0, 2)], axis=-1)
    u_user_item_pad = jnp.stack(
        [jax.random.randint(keys[13], (B, S, Ls), 0, num_items),
         jax.random.randint(keys[14], (B, S, Ls), 1, num_rate)], axis=-1)
    i_user_pad = jnp.stack(
        [jax.random.randint(keys[15], (B, Li), 0, num_users),
         jax.random.randint(keys[16], (B, Li), 1, num_rate)], axis=-1)
    u_avgs = jax.random.uniform(keys[17], (B,), jnp.float32, 1.0, 5.0)
    i_avgs = jax.random.uniform(keys[18], (B,), jnp.float32, 1.0, 5.0)

    fwd = jax.jit(rgprec_forward)
    r_ij = fwd(params, uids, iids, u_itemdiv_pad, u_avgs,
               u_user_pad, u_user_item_pad, i_user_pad, i_avgs)
    r_ij = jax.block_until_ready(r_ij)

    r_ref = rgprec_forward_ref(params, uids, iids, u_itemdiv_pad, u_avgs,
                               u_user_pad, u_user_item_pad, i_user_pad, i_avgs)
    r_ref = jax.block_until_ready(r_ref)

    assert r_ij.shape == (B, 1)
    assert bool(jnp.all(jnp.isfinite(r_ij)))
    # tolerance relaxed vs the pure-f32 reference because MXU operands are bf16
    assert bool(jnp.allclose(r_ij, r_ref, atol=1e-2, rtol=1e-2)), (r_ij, r_ref)
    print("KERNEL_OK")
</pallas_src>

<mosaic_0001>
module attributes {stable_mosaic.version = 11 : i64} {
  func.func @attn_agg_kernel(%arg0: i32, %arg1: memref<8x8x33xf32, #tpu.memory_space<vmem>>, %arg2: memref<8x8x32xf32, #tpu.memory_space<vmem>>, %arg3: memref<8x32xf32, #tpu.memory_space<vmem>>, %arg4: memref<33x32xbf16, #tpu.memory_space<vmem>>, %arg5: memref<32x32xbf16, #tpu.memory_space<vmem>>, %arg6: memref<1x32xf32, #tpu.memory_space<vmem>>, %arg7: memref<32x64xbf16, #tpu.memory_space<vmem>>, %arg8: memref<1x64xf32, #tpu.memory_space<vmem>>, %arg9: memref<32x32xbf16, #tpu.memory_space<vmem>>, %arg10: memref<1x1x32xf32, #tpu.memory_space<vmem>>, %arg11: memref<1x1xf32, #tpu.memory_space<vmem>>, %arg12: memref<32x32xbf16, #tpu.memory_space<vmem>>, %arg13: memref<1x32xf32, #tpu.memory_space<vmem>>, %arg14: memref<8x32xf32, #tpu.memory_space<vmem>>) attributes {dimension_semantics = [#tpu.dimension_semantics<parallel>], iteration_bounds = array<i64: 1>, scalar_prefetch = 0 : i64, scratch_operands = 0 : i64, tpu.core_type = #tpu.core_type<tc>, window_params = [{transform_indices = @transform_0, window_bounds = array<i64: 8, 8, 33>}, {transform_indices = @transform_1, window_bounds = array<i64: 8, 8, 32>}, {transform_indices = @transform_2, window_bounds = array<i64: 8, 32>}, {pipeline_mode = #tpu.pipeline_mode<synchronous>, transform_indices = @transform_3, window_bounds = array<i64: 33, 32>}, {pipeline_mode = #tpu.pipeline_mode<synchronous>, transform_indices = @transform_4, window_bounds = array<i64: 32, 32>}, {pipeline_mode = #tpu.pipeline_mode<synchronous>, transform_indices = @transform_5, window_bounds = array<i64: 1, 32>}, {pipeline_mode = #tpu.pipeline_mode<synchronous>, transform_indices = @transform_6, window_bounds = array<i64: 32, 64>}, {pipeline_mode = #tpu.pipeline_mode<synchronous>, transform_indices = @transform_7, window_bounds = array<i64: 1, 64>}, {pipeline_mode = #tpu.pipeline_mode<synchronous>, transform_indices = @transform_8, window_bounds = array<i64: 32, 32>}, {pipeline_mode = #tpu.pipeline_mode<synchronous>, transform_indices = @transform_9, window_bounds = array<i64: 1, 1, 32>}, {pipeline_mode = #tpu.pipeline_mode<synchronous>, transform_indices = @transform_10, window_bounds = array<i64: 1, 1>}, {pipeline_mode = #tpu.pipeline_mode<synchronous>, transform_indices = @transform_11, window_bounds = array<i64: 32, 32>}, {pipeline_mode = #tpu.pipeline_mode<synchronous>, transform_indices = @transform_12, window_bounds = array<i64: 1, 32>}, {transform_indices = @transform_13, window_bounds = array<i64: 8, 32>}]} {
    %c0 = arith.constant 0 : index
    %c0_0 = arith.constant 0 : index
    %c0_1 = arith.constant 0 : index
    %0 = vector.load %arg1[%c0, %c0_0, %c0_1] : memref<8x8x33xf32, #tpu.memory_space<vmem>>, vector<8x8x33xf32>
    %1 = vector.extract_strided_slice %0 {offsets = [0, 0, 32], sizes = [8, 8, 1], strides = [1, 1, 1]} : vector<8x8x33xf32> to vector<8x8x1xf32>
    %2 = vector.shape_cast %0 : vector<8x8x33xf32> to vector<64x33xf32>
    %c0_2 = arith.constant 0 : index
    %c0_3 = arith.constant 0 : index
    %c0_4 = arith.constant 0 : index
    %3 = vector.load %arg2[%c0_2, %c0_3, %c0_4] : memref<8x8x32xf32, #tpu.memory_space<vmem>>, vector<8x8x32xf32>
    %4 = vector.shape_cast %3 : vector<8x8x32xf32> to vector<64x32xf32>
    %c0_5 = arith.constant 0 : index
    %c0_6 = arith.constant 0 : index
    %5 = vector.load %arg3[%c0_5, %c0_6] : memref<8x32xf32, #tpu.memory_space<vmem>>, vector<8x32xf32>
    %6 = arith.truncf %2 : vector<64x33xf32> to vector<64x33xbf16>
    %c0_7 = arith.constant 0 : index
    %c0_8 = arith.constant 0 : index
    %7 = vector.load %arg4[%c0_7, %c0_8] : memref<33x32xbf16, #tpu.memory_space<vmem>>, vector<33x32xbf16>
    %cst = arith.constant dense<0.000000e+00> : vector<64x32xf32>
    %8 = tpu.matmul %6, %7, %cst {dimension_numbers = #tpu.dot_dimension_numbers<[1], [0], [0], [1], [0, 0, 1, 1], [], []>} : vector<64x33xbf16>, vector<33x32xbf16>, vector<64x32xf32> -> vector<64x32xf32>
    %9 = arith.truncf %4 : vector<64x32xf32> to vector<64x32xbf16>
    %c0_9 = arith.constant 0 : index
    %c0_10 = arith.constant 0 : index
    %10 = vector.load %arg5[%c0_9, %c0_10] : memref<32x32xbf16, #tpu.memory_space<vmem>>, vector<32x32xbf16>
    %cst_11 = arith.constant dense<0.000000e+00> : vector<64x32xf32>
    %11 = tpu.matmul %9, %10, %cst_11 {dimension_numbers = #tpu.dot_dimension_numbers<[1], [0], [0], [1], [0, 0, 1, 1], [], []>} : vector<64x32xbf16>, vector<32x32xbf16>, vector<64x32xf32> -> vector<64x32xf32>
    %12 = arith.addf %8, %11 : vector<64x32xf32>
    %c0_12 = arith.constant 0 : index
    %c0_13 = arith.constant 0 : index
    %13 = vector.load %arg6[%c0_12, %c0_13] : memref<1x32xf32, #tpu.memory_space<vmem>>, vector<1x32xf32>
    %14 = vector.broadcast %13 : vector<1x32xf32> to vector<64x32xf32>
    %15 = arith.addf %12, %14 : vector<64x32xf32>
    %16 = math.tanh %15 : vector<64x32xf32>
    %17 = arith.truncf %16 : vector<64x32xf32> to vector<64x32xbf16>
    %c0_14 = arith.constant 0 : index
    %c0_15 = arith.constant 0 : index
    %18 = vector.load %arg7[%c0_14, %c0_15] : memref<32x64xbf16, #tpu.memory_space<vmem>>, vector<32x64xbf16>
    %cst_16 = arith.constant dense<0.000000e+00> : vector<64x64xf32>
    %19 = tpu.matmul %17, %18, %cst_16 {dimension_numbers = #tpu.dot_dimension_numbers<[1], [0], [0], [1], [0, 0, 1, 1], [], []>} : vector<64x32xbf16>, vector<32x64xbf16>, vector<64x64xf32> -> vector<64x64xf32>
    %c0_17 = arith.constant 0 : index
    %c0_18 = arith.constant 0 : index
    %20 = vector.load %arg8[%c0_17, %c0_18] : memref<1x64xf32, #tpu.memory_space<vmem>>, vector<1x64xf32>
    %21 = vector.broadcast %20 : vector<1x64xf32> to vector<64x64xf32>
    %22 = arith.addf %19, %21 : vector<64x64xf32>
    %23 = vector.extract_strided_slice %22 {offsets = [0, 0], sizes = [64, 32], strides = [1, 1]} : vector<64x64xf32> to vector<64x32xf32>
    %24 = vector.shape_cast %23 : vector<64x32xf32> to vector<8x8x32xf32>
    %25 = vector.extract_strided_slice %22 {offsets = [0, 32], sizes = [64, 32], strides = [1, 1]} : vector<64x64xf32> to vector<64x32xf32>
    %26 = vector.shape_cast %25 : vector<64x32xf32> to vector<8x8x32xf32>
    %27 = arith.truncf %5 : vector<8x32xf32> to vector<8x32xbf16>
    %c0_19 = arith.constant 0 : index
    %c0_20 = arith.constant 0 : index
    %28 = vector.load %arg9[%c0_19, %c0_20] : memref<32x32xbf16, #tpu.memory_space<vmem>>, vector<32x32xbf16>
    %cst_21 = arith.constant dense<0.000000e+00> : vector<8x32xf32>
    %29 = tpu.matmul %27, %28, %cst_21 {dimension_numbers = #tpu.dot_dimension_numbers<[1], [0], [0], [1], [0, 0, 1, 1], [], []>} : vector<8x32xbf16>, vector<32x32xbf16>, vector<8x32xf32> -> vector<8x32xf32>
    %30 = vector.shape_cast %29 : vector<8x32xf32> to vector<8x1x32xf32>
    %31 = vector.broadcast %30 : vector<8x1x32xf32> to vector<8x8x32xf32>
    %32 = arith.addf %26, %31 : vector<8x8x32xf32>
    %cst_22 = arith.constant 0.000000e+00 : f32
    %33 = vector.broadcast %cst_22 : f32 to vector<8x8x32xf32>
    %34 = arith.maximumf %32, %33 : vector<8x8x32xf32>
    %c0_23 = arith.constant 0 : index
    %c0_24 = arith.constant 0 : index
    %c0_25 = arith.constant 0 : index
    %35 = vector.load %arg10[%c0_23, %c0_24, %c0_25] : memref<1x1x32xf32, #tpu.memory_space<vmem>>, vector<1x1x32xf32>
    %36 = vector.broadcast %35 : vector<1x1x32xf32> to vector<8x8x32xf32>
    %37 = arith.mulf %34, %36 : vector<8x8x32xf32>
    %cst_26 = arith.constant dense<0.000000e+00> : vector<8x8xf32>
    %38 = vector.multi_reduction <add>, %37, %cst_26 [2] : vector<8x8x32xf32> to vector<8x8xf32>
    %39 = vector.shape_cast %38 : vector<8x8xf32> to vector<8x8x1xf32>
    %c0_27 = arith.constant 0 : index
    %c0_28 = arith.constant 0 : index
    %40 = vector.load %arg11[%c0_27, %c0_28] : memref<1x1xf32, #tpu.memory_space<vmem>>, vector<1x1xf32>
    %41 = vector.shape_cast %40 : vector<1x1xf32> to vector<1x1x1xf32>
    %42 = vector.broadcast %41 : vector<1x1x1xf32> to vector<8x8x1xf32>
    %43 = arith.addf %39, %42 : vector<8x8x1xf32>
    %cst_29 = arith.constant dense<0xFF800000> : vector<8x1xf32>
    %44 = vector.multi_reduction <maximumf>, %43, %cst_29 [1] : vector<8x8x1xf32> to vector<8x1xf32>
    %45 = vector.shape_cast %44 : vector<8x1xf32> to vector<8x1x1xf32>
    %46 = vector.broadcast %45 : vector<8x1x1xf32> to vector<8x8x1xf32>
    %47 = arith.subf %43, %46 : vector<8x8x1xf32>
    %48 = math.exp %47 : vector<8x8x1xf32>
    %49 = arith.mulf %48, %1 : vector<8x8x1xf32>
    %cst_30 = arith.constant dense<0.000000e+00> : vector<8x1xf32>
    %50 = vector.multi_reduction <add>, %49, %cst_30 [1] : vector<8x8x1xf32> to vector<8x1xf32>
    %51 = vector.shape_cast %50 : vector<8x1xf32> to vector<8x1x1xf32>
    %cst_31 = arith.constant 1.000000e-10 : f32
    %52 = vector.broadcast %cst_31 : f32 to vector<8x1x1xf32>
    %53 = arith.addf %51, %52 : vector<8x1x1xf32>
    %54 = tpu.reciprocal %53 {approx = true} : vector<8x1x1xf32> -> vector<8x1x1xf32>
    %55 = vector.broadcast %54 : vector<8x1x1xf32> to vector<8x8x1xf32>
    %56 = arith.mulf %49, %55 : vector<8x8x1xf32>
    %57 = vector.broadcast %56 : vector<8x8x1xf32> to vector<8x8x32xf32>
    %58 = arith.mulf %57, %24 : vector<8x8x32xf32>
    %cst_32 = arith.constant dense<0.000000e+00> : vector<8x32xf32>
    %59 = vector.multi_reduction <add>, %58, %cst_32 [1] : vector<8x8x32xf32> to vector<8x32xf32>
    %60 = arith.truncf %59 : vector<8x32xf32> to vector<8x32xbf16>
    %c0_33 = arith.constant 0 : index
    %c0_34 = arith.constant 0 : index
    %61 = vector.load %arg12[%c0_33, %c0_34] : memref<32x32xbf16, #tpu.memory_space<vmem>>, vector<32x32xbf16>
    %cst_35 = arith.constant dense<0.000000e+00> : vector<8x32xf32>
    %62 = tpu.matmul %60, %61, %cst_35 {dimension_numbers = #tpu.dot_dimension_numbers<[1], [0], [0], [1], [0, 0, 1, 1], [], []>} : vector<8x32xbf16>, vector<32x32xbf16>, vector<8x32xf32> -> vector<8x32xf32>
    %c0_36 = arith.constant 0 : index
    %c0_37 = arith.constant 0 : index
    %63 = vector.load %arg13[%c0_36, %c0_37] : memref<1x32xf32, #tpu.memory_space<vmem>>, vector<1x32xf32>
    %64 = vector.broadcast %63 : vector<1x32xf32> to vector<8x32xf32>
    %65 = arith.addf %62, %64 : vector<8x32xf32>
    %66 = math.tanh %65 : vector<8x32xf32>
    %c0_38 = arith.constant 0 : index
    %c0_39 = arith.constant 0 : index
    %67 = vector.load %arg14[%c0_38, %c0_39] : memref<8x32xf32, #tpu.memory_space<vmem>>, vector<8x32xf32>
    tpu.vector_store %arg14[%c0_38, %c0_39], %66 {strides = array<i32>} : memref<8x32xf32, #tpu.memory_space<vmem>>, vector<8x32xf32>,
    return
  }
  func.func @transform_0(%arg0: i32) -> (i32, i32, i32) {
    %c0_i32 = arith.constant 0 : i32
    %c0_i32_0 = arith.constant 0 : i32
    %c0_i32_1 = arith.constant 0 : i32
    return %arg0, %c0_i32, %c0_i32_0 : i32, i32, i32
  }
  func.func @transform_1(%arg0: i32) -> (i32, i32, i32) {
    %c0_i32 = arith.constant 0 : i32
    %c0_i32_0 = arith.constant 0 : i32
    %c0_i32_1 = arith.constant 0 : i32
    return %arg0, %c0_i32, %c0_i32_0 : i32, i32, i32
  }
  func.func @transform_2(%arg0: i32) -> (i32, i32) {
    %c0_i32 = arith.constant 0 : i32
    %c0_i32_0 = arith.constant 0 : i32
    return %arg0, %c0_i32 : i32, i32
  }
  func.func @transform_3(%arg0: i32) -> (i32, i32) {
    %c0_i32 = arith.constant 0 : i32
    %c0_i32_0 = arith.constant 0 : i32
    %c0_i32_1 = arith.constant 0 : i32
    return %c0_i32, %c0_i32_0 : i32, i32
  }
  func.func @transform_4(%arg0: i32) -> (i32, i32) {
    %c0_i32 = arith.constant 0 : i32
    %c0_i32_0 = arith.constant 0 : i32
    %c0_i32_1 = arith.constant 0 : i32
    return %c0_i32, %c0_i32_0 : i32, i32
  }
  func.func @transform_5(%arg0: i32) -> (i32, i32) {
    %c0_i32 = arith.constant 0 : i32
    %c0_i32_0 = arith.constant 0 : i32
    %c0_i32_1 = arith.constant 0 : i32
    return %c0_i32, %c0_i32_0 : i32, i32
  }
  func.func @transform_6(%arg0: i32) -> (i32, i32) {
    %c0_i32 = arith.constant 0 : i32
    %c0_i32_0 = arith.constant 0 : i32
    %c0_i32_1 = arith.constant 0 : i32
    return %c0_i32, %c0_i32_0 : i32, i32
  }
  func.func @transform_7(%arg0: i32) -> (i32, i32) {
    %c0_i32 = arith.constant 0 : i32
    %c0_i32_0 = arith.constant 0 : i32
    %c0_i32_1 = arith.constant 0 : i32
    return %c0_i32, %c0_i32_0 : i32, i32
  }
  func.func @transform_8(%arg0: i32) -> (i32, i32) {
    %c0_i32 = arith.constant 0 : i32
    %c0_i32_0 = arith.constant 0 : i32
    %c0_i32_1 = arith.constant 0 : i32
    return %c0_i32, %c0_i32_0 : i32, i32
  }
  func.func @transform_9(%arg0: i32) -> (i32, i32, i32) {
    %c0_i32 = arith.constant 0 : i32
    %c0_i32_0 = arith.constant 0 : i32
    %c0_i32_1 = arith.constant 0 : i32
    %c0_i32_2 = arith.constant 0 : i32
    return %c0_i32, %c0_i32_0, %c0_i32_1 : i32, i32, i32
  }
  func.func @transform_10(%arg0: i32) -> (i32, i32) {
    %c0_i32 = arith.constant 0 : i32
    %c0_i32_0 = arith.constant 0 : i32
    %c0_i32_1 = arith.constant 0 : i32
    return %c0_i32, %c0_i32_0 : i32, i32
  }
  func.func @transform_11(%arg0: i32) -> (i32, i32) {
    %c0_i32 = arith.constant 0 : i32
    %c0_i32_0 = arith.constant 0 : i32
    %c0_i32_1 = arith.constant 0 : i32
    return %c0_i32, %c0_i32_0 : i32, i32
  }
  func.func @transform_12(%arg0: i32) -> (i32, i32) {
    %c0_i32 = arith.constant 0 : i32
    %c0_i32_0 = arith.constant 0 : i32
    %c0_i32_1 = arith.constant 0 : i32
    return %c0_i32, %c0_i32_0 : i32, i32
  }
  func.func @transform_13(%arg0: i32) -> (i32, i32) {
    %c0_i32 = arith.constant 0 : i32
    %c0_i32_0 = arith.constant 0 : i32
    return %arg0, %c0_i32 : i32, i32
  }
}

module attributes {stable_mosaic.version = 11 : i64} {
  func.func @rate_pred_kernel(%arg0: i32, %arg1: memref<8x8x33xf32, #tpu.memory_space<vmem>>, %arg2: memref<8x32xf32, #tpu.memory_space<vmem>>, %arg3: memref<33x32xbf16, #tpu.memory_space<vmem>>, %arg4: memref<32x32xbf16, #tpu.memory_space<vmem>>, %arg5: memref<1x32xf32, #tpu.memory_space<vmem>>, %arg6: memref<32x32xbf16, #tpu.memory_space<vmem>>, %arg7: memref<1x32xf32, #tpu.memory_space<vmem>>, %arg8: memref<1x32xf32, #tpu.memory_space<vmem>>, %arg9: memref<1x1xf32, #tpu.memory_space<vmem>>, %arg10: memref<8x1xf32, #tpu.memory_space<vmem>>) attributes {dimension_semantics = [#tpu.dimension_semantics<parallel>], iteration_bounds = array<i64: 1>, scalar_prefetch = 0 : i64, scratch_operands = 0 : i64, tpu.core_type = #tpu.core_type<tc>, window_params = [{transform_indices = @transform_0, window_bounds = array<i64: 8, 8, 33>}, {transform_indices = @transform_1, window_bounds = array<i64: 8, 32>}, {pipeline_mode = #tpu.pipeline_mode<synchronous>, transform_indices = @transform_2, window_bounds = array<i64: 33, 32>}, {pipeline_mode = #tpu.pipeline_mode<synchronous>, transform_indices = @transform_3, window_bounds = array<i64: 32, 32>}, {pipeline_mode = #tpu.pipeline_mode<synchronous>, transform_indices = @transform_4, window_bounds = array<i64: 1, 32>}, {pipeline_mode = #tpu.pipeline_mode<synchronous>, transform_indices = @transform_5, window_bounds = array<i64: 32, 32>}, {pipeline_mode = #tpu.pipeline_mode<synchronous>, transform_indices = @transform_6, window_bounds = array<i64: 1, 32>}, {pipeline_mode = #tpu.pipeline_mode<synchronous>, transform_indices = @transform_7, window_bounds = array<i64: 1, 32>}, {pipeline_mode = #tpu.pipeline_mode<synchronous>, transform_indices = @transform_8, window_bounds = array<i64: 1, 1>}, {transform_indices = @transform_9, window_bounds = array<i64: 8, 1>}]} {
    %c0 = arith.constant 0 : index
    %c0_0 = arith.constant 0 : index
    %c0_1 = arith.constant 0 : index
    %0 = vector.load %arg1[%c0, %c0_0, %c0_1] : memref<8x8x33xf32, #tpu.memory_space<vmem>>, vector<8x8x33xf32>
    %1 = vector.extract_strided_slice %0 {offsets = [0, 0, 32], sizes = [8, 8, 1], strides = [1, 1, 1]} : vector<8x8x33xf32> to vector<8x8x1xf32>
    %2 = vector.shape_cast %0 : vector<8x8x33xf32> to vector<64x33xf32>
    %c0_2 = arith.constant 0 : index
    %c0_3 = arith.constant 0 : index
    %3 = vector.load %arg2[%c0_2, %c0_3] : memref<8x32xf32, #tpu.memory_space<vmem>>, vector<8x32xf32>
    %4 = arith.truncf %3 : vector<8x32xf32> to vector<8x32xbf16>
    %c0_4 = arith.constant 0 : index
    %c0_5 = arith.constant 0 : index
    %5 = vector.load %arg4[%c0_4, %c0_5] : memref<32x32xbf16, #tpu.memory_space<vmem>>, vector<32x32xbf16>
    %cst = arith.constant dense<0.000000e+00> : vector<8x32xf32>
    %6 = tpu.matmul %4, %5, %cst {dimension_numbers = #tpu.dot_dimension_numbers<[1], [0], [0], [1], [0, 0, 1, 1], [], []>} : vector<8x32xbf16>, vector<32x32xbf16>, vector<8x32xf32> -> vector<8x32xf32>
    %c0_6 = arith.constant 0 : index
    %c0_7 = arith.constant 0 : index
    %7 = vector.load %arg5[%c0_6, %c0_7] : memref<1x32xf32, #tpu.memory_space<vmem>>, vector<1x32xf32>
    %8 = vector.broadcast %7 : vector<1x32xf32> to vector<8x32xf32>
    %9 = arith.addf %6, %8 : vector<8x32xf32>
    %10 = arith.truncf %2 : vector<64x33xf32> to vector<64x33xbf16>
    %c0_8 = arith.constant 0 : index
    %c0_9 = arith.constant 0 : index
    %11 = vector.load %arg3[%c0_8, %c0_9] : memref<33x32xbf16, #tpu.memory_space<vmem>>, vector<33x32xbf16>
    %cst_10 = arith.constant dense<0.000000e+00> : vector<64x32xf32>
    %12 = tpu.matmul %10, %11, %cst_10 {dimension_numbers = #tpu.dot_dimension_numbers<[1], [0], [0], [1], [0, 0, 1, 1], [], []>} : vector<64x33xbf16>, vector<33x32xbf16>, vector<64x32xf32> -> vector<64x32xf32>
    %13 = vector.shape_cast %12 : vector<64x32xf32> to vector<8x8x32xf32>
    %14 = vector.shape_cast %9 : vector<8x32xf32> to vector<8x1x32xf32>
    %15 = vector.broadcast %14 : vector<8x1x32xf32> to vector<8x8x32xf32>
    %16 = arith.addf %13, %15 : vector<8x8x32xf32>
    %17 = math.tanh %16 : vector<8x8x32xf32>
    %18 = vector.shape_cast %17 : vector<8x8x32xf32> to vector<64x32xf32>
    %19 = arith.truncf %18 : vector<64x32xf32> to vector<64x32xbf16>
    %c0_11 = arith.constant 0 : index
    %c0_12 = arith.constant 0 : index
    %20 = vector.load %arg6[%c0_11, %c0_12] : memref<32x32xbf16, #tpu.memory_space<vmem>>, vector<32x32xbf16>
    %cst_13 = arith.constant dense<0.000000e+00> : vector<64x32xf32>
    %21 = tpu.matmul %19, %20, %cst_13 {dimension_numbers = #tpu.dot_dimension_numbers<[1], [0], [0], [1], [0, 0, 1, 1], [], []>} : vector<64x32xbf16>, vector<32x32xbf16>, vector<64x32xf32> -> vector<64x32xf32>
    %c0_14 = arith.constant 0 : index
    %c0_15 = arith.constant 0 : index
    %22 = vector.load %arg7[%c0_14, %c0_15] : memref<1x32xf32, #tpu.memory_space<vmem>>, vector<1x32xf32>
    %23 = vector.broadcast %22 : vector<1x32xf32> to vector<64x32xf32>
    %24 = arith.addf %21, %23 : vector<64x32xf32>
    %25 = math.tanh %24 : vector<64x32xf32>
    %c0_16 = arith.constant 0 : index
    %c0_17 = arith.constant 0 : index
    %26 = vector.load %arg8[%c0_16, %c0_17] : memref<1x32xf32, #tpu.memory_space<vmem>>, vector<1x32xf32>
    %27 = vector.broadcast %26 : vector<1x32xf32> to vector<64x32xf32>
    %28 = arith.mulf %25, %27 : vector<64x32xf32>
    %cst_18 = arith.constant dense<0.000000e+00> : vector<64xf32>
    %29 = vector.multi_reduction <add>, %28, %cst_18 [1] : vector<64x32xf32> to vector<64xf32>
    %30 = vector.shape_cast %29 : vector<64xf32> to vector<64x1xf32>
    %c0_19 = arith.constant 0 : index
    %c0_20 = arith.constant 0 : index
    %31 = vector.load %arg9[%c0_19, %c0_20] : memref<1x1xf32, #tpu.memory_space<vmem>>, vector<1x1xf32>
    %32 = vector.broadcast %31 : vector<1x1xf32> to vector<64x1xf32>
    %33 = arith.addf %30, %32 : vector<64x1xf32>
    %34 = vector.shape_cast %33 : vector<64x1xf32> to vector<8x8x1xf32>
    %35 = arith.mulf %34, %1 : vector<8x8x1xf32>
    %cst_21 = arith.constant dense<0.000000e+00> : vector<8x1xf32>
    %36 = vector.multi_reduction <add>, %35, %cst_21 [1] : vector<8x8x1xf32> to vector<8x1xf32>
    %c0_22 = arith.constant 0 : index
    %c0_23 = arith.constant 0 : index
    %37 = vector.load %arg10[%c0_22, %c0_23] : memref<8x1xf32, #tpu.memory_space<vmem>>, vector<8x1xf32>
    tpu.vector_store %arg10[%c0_22, %c0_23], %36 {strides = array<i32>} : memref<8x1xf32, #tpu.memory_space<vmem>>, vector<8x1xf32>,
    return
  }
  func.func @transform_0(%arg0: i32) -> (i32, i32, i32) {
    %c0_i32 = arith.constant 0 : i32
    %c0_i32_0 = arith.constant 0 : i32
    %c0_i32_1 = arith.constant 0 : i32
    return %arg0, %c0_i32, %c0_i32_0 : i32, i32, i32
  }
  func.func @transform_1(%arg0: i32) -> (i32, i32) {
    %c0_i32 = arith.constant 0 : i32
    %c0_i32_0 = arith.constant 0 : i32
    return %arg0, %c0_i32 : i32, i32
  }
  func.func @transform_2(%arg0: i32) -> (i32, i32) {
    %c0_i32 = arith.constant 0 : i32
    %c0_i32_0 = arith.constant 0 : i32
    %c0_i32_1 = arith.constant 0 : i32
    return %c0_i32, %c0_i32_0 : i32, i32
  }
  func.func @transform_3(%arg0: i32) -> (i32, i32) {
    %c0_i32 = arith.constant 0 : i32
    %c0_i32_0 = arith.constant 0 : i32
    %c0_i32_1 = arith.constant 0 : i32
    return %c0_i32, %c0_i32_0 : i32, i32
  }
  func.func @transform_4(%arg0: i32) -> (i32, i32) {
    %c0_i32 = arith.constant 0 : i32
    %c0_i32_0 = arith.constant 0 : i32
    %c0_i32_1 = arith.constant 0 : i32
    return %c0_i32, %c0_i32_0 : i32, i32
  }
  func.func @transform_5(%arg0: i32) -> (i32, i32) {
    %c0_i32 = arith.constant 0 : i32
    %c0_i32_0 = arith.constant 0 : i32
    %c0_i32_1 = arith.constant 0 : i32
    return %c0_i32, %c0_i32_0 : i32, i32
  }
  func.func @transform_6(%arg0: i32) -> (i32, i32) {
    %c0_i32 = arith.constant 0 : i32
    %c0_i32_0 = arith.constant 0 : i32
    %c0_i32_1 = arith.constant 0 : i32
    return %c0_i32, %c0_i32_0 : i32, i32
  }
  func.func @transform_7(%arg0: i32) -> (i32, i32) {
    %c0_i32 = arith.constant 0 : i32
    %c0_i32_0 = arith.constant 0 : i32
    %c0_i32_1 = arith.constant 0 : i32
    return %c0_i32, %c0_i32_0 : i32, i32
  }
  func.func @transform_8(%arg0: i32) -> (i32, i32) {
    %c0_i32 = arith.constant 0 : i32
    %c0_i32_0 = arith.constant 0 : i32
    %c0_i32_1 = arith.constant 0 : i32
    return %c0_i32, %c0_i32_0 : i32, i32
  }
  func.func @transform_9(%arg0: i32) -> (i32, i32) {
    %c0_i32 = arith.constant 0 : i32
    %c0_i32_0 = arith.constant 0 : i32
    return %arg0, %c0_i32 : i32, i32
  }
}

</mosaic_0001>

<bundles_post_ra>
// kernel: rgprec_forward.7
= control target key start
LH: loop header
LB: loop body
LE: loop exit
PB: predicated region body
PF: predicated region fallthrough
CT: control target
= control target key end

     0   :  { %vm149_vm0 = vcmask 1040384   ;;  %v731_v0 = vmov 0.0   ;;  %vm732_vm1 = vmmov 0   ;;  %v733_v5 = vmov 0   ;;  %s734_s17 = smov 96   ;;  %s892_s3 = inlined_call_operand.vmem [shape: bf16[32,32], index: 3, kind: input, shape index: {}]   ;;  %s893_s2 = inlined_call_operand.vmem [shape: bf16[33,32], index: 2, kind: input, shape index: {}]   ;;  %s894_s1 = inlined_call_operand.vmem [shape: f32[8,32], index: 1, kind: input, shape index: {}]   ;;  %s895_s0 = inlined_call_operand.vmem [shape: f32[8,8,33], index: 0, kind: input, shape index: {}]   ;;  %s896_s5 = inlined_call_operand.vmem [shape: bf16[32,32], index: 5, kind: input, shape index: {}]   ;;  %s897_s4 = inlined_call_operand.vmem [shape: f32[1,32], index: 4, kind: input, shape index: {}]   ;;  %s898_s8 = inlined_call_operand.<no memory space> [shape: f32[1,1], index: 8, kind: input, shape index: {}]   ;;  %s899_s6 = inlined_call_operand.vmem [shape: f32[1,32], index: 6, kind: input, shape index: {}]   ;;  %s900_s7 = inlined_call_operand.vmem [shape: f32[1,32], index: 7, kind: input, shape index: {}]   ;;  %s901_s9 = inlined_call_operand.vmem [shape: f32[8,1], index: 9, kind: output, shape index: {}]  }
   0x1   :  { %653 = vmatprep.subr.bf16.mxu0 %v731_v0  ;;  %v692_v1 = vld [vmem:[%s892_s3] sm:$0xff]   ;;  %657 = vmatprep.mubr.msk.bf16.mxu0 %vm732_vm1, %v731_v0  ;;  %v694_v3 = vld [vmem:[%s892_s3 + $0x8] sm:$0xff]   ;;  %v151_v6 = vsel %vm149_vm0, 65535, %v733_v5  ;;  %v696_v8 = vld [vmem:[%s893_s2 + $0x10] ss:$0 sps:$4 sm:$0x11]   ;;  %v225_v27 = vlaneseq }
   0x2   :  { %v693_v2 = vld [vmem:[%s893_s2] sm:$0xff]   ;;  %654 = vmatpush3.bf16.msra.mxu0 %v692_v1  ;;  %v695_v4 = vld [vmem:[%s893_s2 + $0x8] sm:$0xff]   ;;  %vm136_vm2 = vcmask 269312   ;;  %vm68_vm3 = vcmask 261120   ;;  %v153_v12 = vand.u32 %v696_v8, %v151_v6  ;;  %v37_v14 = vld [vmem:[%s895_s0 + $0x10] sm:$0xff]  ;;  %vm532_vm4 = vcmask 7168  }
   0x3   :  { %661 = vmatprep.subr.bf16.mxu1 %v693_v2  ;;  %655 = vmatprep.subr.bf16.mxu0 %v731_v0  ;;  %v43_v7 = vld [vmem:[%s894_s1] sm:$0xff]  ;;  %v36_v11 = vld [vmem:[%s895_s0 + $0x8] sm:$0xff]  ;;  %v38_v15 = vld [vmem:[%s895_s0 + $0x18] sm:$0xff]  ;;  %v735_v25 = vmov 1966171168   ;;  %v226_v29 = vshrl.u32 %v225_v27, 7 }
   0x4   :  { %662 = vmatpush3.bf16.msra.mxu1 %v693_v2  ;;  %v44_v9 = vpack.c.bf16 %v43_v7, %v43_v7  ;;  %v35_v10 = vld [vmem:[%s895_s0] sm:$0xff]  ;;  %v40_v17 = vld [vmem:[%s895_s0 + $0x28] sm:$0xff]  ;;  %v113_v18 = vpack.c.bf16 %v38_v15, %v37_v14  ;;  %v829_v20 = vld [vmem:[%s895_s0 + $0x30] sm:$0xff]  ;;  %502 = vrot.lane.b32.xlu1 %v36_v11, %s734_s17  ;;  %v223_v26 = vunpack.c.l.s4 %v735_v25  ;;  %vm597_vm5 = vcmask 1041409  }
   0x5   :  { %663 = vmatprep.subr.bf16.mxu1 %v695_v4  ;;  %v112_v13 = vpack.c.bf16 %v36_v11, %v35_v10  ;;  %v39_v16 = vld [vmem:[%s895_s0 + $0x20] sm:$0xff]  ;;  %v834_v21 = vld [vmem:[%s895_s0 + $0x38] sm:$0xff]  ;;  %v698_v24 = vld [vmem:[%s896_s5 + $0x8] sm:$0xff]   ;;  %500 = vrot.lane.b32.xlu0 %v35_v10, %s734_s17  ;;  %v272_v38 = vsub.s32 0, %v226_v29  ;;  %vm599_vm6 = vcmask 1042434   ;;  %vm601_vm7 = vcmask 1043459  }
   0x6   :  { %656 = vmatpush3.bf16.msra.mxu0 %v694_v3  ;;  %v114_v19 = vpack.c.bf16 %v40_v17, %v39_v16  ;;  %v115_v22 = vpack.c.bf16 %v834_v21, %v829_v20  ;;  %v697_v23 = vld [vmem:[%s896_s5] sm:$0xff]   ;;  %v224_v28 = vunpack.c.0.s8 %v223_v26  ;;  %v14_v25 = vstv %s898_s8 }
   0x7   :  { %667 = vmatprep.mubr.msk.bf16.mxu1 %vm136_vm2, %v112_v13  ;;  %675 = vmatprep.subr.bf16.mxu0 %v697_v23  ;;  %v617_v30 = vld [vmem:[%s897_s4] ss:$0 sm:$0xff]  ;;  %15 = vst [vmem:[#allocation2] sm:$0x1] %v14_v25  ;;  %vm603_vm8 = vcmask 1044484   ;;  %vm605_vm9 = vcmask 1045509  }
   0x8   :  { %664 = vmatpush3.bf16.msra.mxu1 %v695_v4  ;;  %504 = vrot.lane.b32.xlu1 %v37_v14, %s734_s17  ;;  %v227_v31 = vsub.s32 %v224_v28, %v226_v29  ;;  %v628_v26 = vld [vmem:[%s899_s6] ss:$0 sm:$0xff]  ;;  %vm607_vm10 = vcmask 1046534   ;;  %vm609_vm11 = vcmask 1047559  }
   0x9   :  { %658 = vmatmul.mubr.msk.bf16.vlgmr.msra.gmra.mrb[0].mxu0 %vm68_vm3, %v44_v9  ;;  %665 = vmatprep.subr.bf16.mxu1 %v153_v12 }
   0xa   :  { %676 = vmatpush3.bf16.msra.mxu0 %v697_v23  ;;  %508 = vrot.lane.b32.xlu0 %v39_v16, %s734_s17 }
   0xb   :  { %677 = vmatprep.subr.bf16.mxu0 %v698_v24 }
   0xc   :  { %666 = vmatpush3.bf16.msra.mxu1 %v153_v12  ;;  %506 = vrot.lane.b32.xlu1 %v38_v15, %s734_s17 }
   0xe   :  { %678 = vmatpush3.bf16.msra.mxu0 %v698_v24 }
   0xf   :  { %668 = vmatmul.mubr.msk.bf16.vlgmr.msra.gmra.mrb[0].mxu1 %vm136_vm2, %v113_v18 }
  0x10   :  { %671 = vmatprep.mubr.msk.bf16.mxu1 %vm136_vm2, %v114_v19  ;;  %510 = vrot.lane.b32.xlu1 %v40_v17, %s734_s17 }
  0x17   :  { %672 = vmatmul.mubr.msk.bf16.gmra.mrb[4].mxu1 %vm136_vm2, %v115_v22 }
  0xdc   :  { %v106_v32 = vpop.f32.mrb[0].mxu0 }
  0xdd   :  { %v107_v33 = vadd.f32 %v617_v30, %v106_v32  ;;  %v659_v34 = vpop.f32.mrb[1].mxu0 }
  0xde   :  { %v109_v35 = vpop.f32.mrb[2].mxu0 }
  0xdf   :  { %v221_v36 = vcombine.high %v107_v33, %v107_v33  ;;  %v228_v37 = vrot.slane %v107_v33, %v227_v31  ;;  %v660_v39 = vpop.f32.mrb[3].mxu0 }
  0xe1   :  { %v235_v40 = vrot.slane %v221_v36, %v227_v31  ;;  %v236_v41 = vcombine.high %v228_v37, %v228_v37  ;;  %v244_v42 = vrot.slane %v228_v37, %v227_v31 }
  0xe2   :  { %v669_v43 = vpop.f32.mrb[0].mxu1 }
  0xe3   :  { %v237_v44 = vcombine.high %v235_v40, %v235_v40  ;;  %v266_v45 = vcombine.high %v244_v42, %v244_v42  ;;  %v189_v46 = vpop.f32.mrb[1].mxu1  ;;  %v273_v47 = vrot.slane %v244_v42, %v272_v38  ;;  %v258_v48 = vrot.slane %v236_v41, %v227_v31  ;;  %v635_v42 = vld [vmem:[%s900_s7] ss:$0 sm:$0xff] }
  0xe4   :  { %v670_v49 = vpop.f32.mrb[2].mxu1  ;;  %v251_v50 = vrot.slane %v235_v40, %v227_v31 }
  0xe5   :  { %v281_v51 = vrot.slane %v266_v45, %v272_v38  ;;  %v310_v52 = vadd.f32 %v273_v47, %v189_v46  ;;  %v268_v53 = vcombine.high %v258_v48, %v258_v48  ;;  %v192_v54 = vpop.f32.mrb[3].mxu1  ;;  %v277_v55 = vrot.slane %v258_v48, %v272_v38 }
  0xe6   :  { %v267_v56 = vcombine.high %v251_v50, %v251_v50  ;;  %v265_v57 = vrot.slane %v237_v44, %v227_v31  ;;  %v289_v1 = vrot.slane %v251_v50, %v272_v38 }
  0xe7   :  { %v312_v58 = vadd.f32 %v669_v43, %v281_v51  ;;  %v285_v59 = vrot.slane %v268_v53, %v272_v38  ;;  %v311_v60 = vadd.f32 %v277_v55, %v192_v54  ;;  %699 = vtanh.f32 %v310_v52 }
  0xe8   :  { %v297_v61 = vrot.slane %v267_v56, %v272_v38  ;;  %v269_v62 = vcombine.high %v265_v57, %v265_v57  ;;  %v293_v7 = vrot.slane %v265_v57, %v272_v38 }
  0xe9   :  { %701 = vtanh.f32 %v312_v58  ;;  %v313_v63 = vadd.f32 %v670_v49, %v285_v59 }
  0xea   :  { %703 = vtanh.f32 %v311_v60  ;;  %v673_v0 = vpop.f32.mrb[4].mxu1  ;;  %v301_v2 = vrot.slane %v269_v62, %v272_v38 }
  0xeb   :  { %705 = vtanh.f32 %v313_v63  ;;  %v316_v3 = vadd.f32 %v673_v0, %v297_v61  ;;  %v205_v4 = vpop.f32.mrb[5].mxu1 }
  0xec   :  { %v314_v5 = vadd.f32 %v289_v1, %v205_v4  ;;  %v674_v6 = vpop.f32.mrb[6].mxu1  ;;  %v503_v4 = vpop.permute.xlu1 %502 }
  0xed   :  { %707 = vtanh.f32 %v316_v3  ;;  %v317_v8 = vadd.f32 %v674_v6, %v301_v2  ;;  %v208_v9 = vpop.f32.mrb[7].mxu1 }
  0xee   :  { %709 = vtanh.f32 %v314_v5  ;;  %v315_v10 = vadd.f32 %v293_v7, %v208_v9  ;;  %v501_v7 = vpop.permute.xlu0 %500 }
  0xef   :  { %711 = vtanh.f32 %v317_v8 }
  0xf0   :  { %713 = vtanh.f32 %v315_v10  ;;  %v505_v5 = vpop.permute.xlu1 %504  ;;  %v636_v10 = vld [vmem:[#allocation2] ss:$0 sm:$0xff] }
  0xf1   :  { %v700_v11 = vpop.eup %699 }
  0xf2   :  { %v509_v9 = vpop.permute.xlu0 %508 }
  0xf3   :  { %v702_v12 = vpop.eup %701 }
  0xf4   :  { %v704_v13 = vpop.eup %703  ;;  %v507_v6 = vpop.permute.xlu1 %506 }
  0xf5   :  { %v706_v14 = vpop.eup %705  ;;  %v326_v15 = vpack.c.bf16 %v704_v13, %v700_v11 }
  0xf6   :  { %v327_v16 = vpack.c.bf16 %v706_v14, %v702_v12 }
  0xf7   :  { %v708_v17 = vpop.eup %707  ;;  %679 = vmatprep.mubr.msk.bf16.mxu0 %vm68_vm3, %v326_v15 }
  0xf8   :  { %v710_v18 = vpop.eup %709  ;;  %680 = vmatmul.mubr.msk.bf16.vlgmr.msra.gmra.mrb[4].mxu0 %vm68_vm3, %v327_v16  ;;  %v511_v8 = vpop.permute.xlu1 %510 }
  0xf9   :  { %v712_v19 = vpop.eup %711 }
  0xfa   :  { %v714_v22 = vpop.eup %713  ;;  %v329_v23 = vpack.c.bf16 %v712_v19, %v708_v17 }
  0xfb   :  { %v328_v24 = vpack.c.bf16 %v714_v22, %v710_v18 }
  0xfd   :  { %683 = vmatprep.mubr.msk.bf16.mxu0 %vm68_vm3, %v328_v24 }
 0x100   :  { %684 = vmatmul.mubr.msk.bf16.gmra.mrb[8].mxu0 %vm68_vm3, %v329_v23 }
 0x1cb   :  { %v681_v27 = vpop.f32.mrb[4].mxu0 }
 0x1cc   :  { %v408_v28 = vadd.f32 %v681_v27, %v628_v26  ;;  %v399_v29 = vpop.f32.mrb[5].mxu0 }
 0x1cd   :  { %v400_v30 = vadd.f32 %v628_v26, %v399_v29  ;;  %v682_v31 = vpop.f32.mrb[6].mxu0 }
 0x1ce   :  { %715 = vtanh.f32 %v408_v28  ;;  %v411_v32 = vadd.f32 %v682_v31, %v628_v26  ;;  %v402_v33 = vpop.f32.mrb[7].mxu0 }
 0x1cf   :  { %717 = vtanh.f32 %v400_v30  ;;  %v403_v34 = vadd.f32 %v628_v26, %v402_v33 }
 0x1d0   :  { %719 = vtanh.f32 %v411_v32 }
 0x1d1   :  { %721 = vtanh.f32 %v403_v34 }
 0x1d3   :  { %v685_v35 = vpop.f32.mrb[8].mxu0 }
 0x1d4   :  { %v424_v36 = vadd.f32 %v685_v35, %v628_v26  ;;  %v415_v37 = vpop.f32.mrb[9].mxu0 }
 0x1d5   :  { %v416_v38 = vadd.f32 %v628_v26, %v415_v37  ;;  %v686_v39 = vpop.f32.mrb[10].mxu0 }
 0x1d6   :  { %723 = vtanh.f32 %v424_v36  ;;  %v427_v40 = vadd.f32 %v686_v39, %v628_v26  ;;  %v418_v41 = vpop.f32.mrb[11].mxu0 }
 0x1d7   :  { %725 = vtanh.f32 %v416_v38  ;;  %v419_v43 = vadd.f32 %v628_v26, %v418_v41 }
 0x1d8   :  { %v716_v44 = vpop.eup %715  ;;  %727 = vtanh.f32 %v427_v40 }
 0x1d9   :  { %v718_v45 = vpop.eup %717  ;;  %729 = vtanh.f32 %v419_v43  ;;  %v447_v46 = vmul.f32 %v716_v44, %v635_v42 }
 0x1da   :  { %v720_v47 = vpop.eup %719  ;;  %v445_v48 = vmul.f32 %v718_v45, %v635_v42 }
 0x1db   :  { %v722_v49 = vpop.eup %721  ;;  %v459_v50 = vsel %vm68_vm3, %v447_v46, 0.0  ;;  %v448_v51 = vmul.f32 %v720_v47, %v635_v42 }
 0x1dc   :  { %460 = vadd.xlane.f32.xlu1 %v459_v50  ;;  %v453_v52 = vsel %vm68_vm3, %v445_v48, 0.0  ;;  %v446_v53 = vmul.f32 %v722_v49, %v635_v42 }
 0x1dd   :  { %454 = vadd.xlane.f32.xlu0 %v453_v52  ;;  %v462_v54 = vsel %vm68_vm3, %v448_v51, 0.0 }
 0x1de   :  { %v456_v56 = vsel %vm68_vm3, %v446_v53, 0.0 }
 0x1e0   :  { %v724_v55 = vpop.eup %723  ;;  %463 = vadd.xlane.f32.xlu1 %v462_v54 }
 0x1e1   :  { %v726_v57 = vpop.eup %725  ;;  %457 = vadd.xlane.f32.xlu0 %v456_v56  ;;  %v451_v58 = vmul.f32 %v724_v55, %v635_v42 }
 0x1e2   :  { %v728_v59 = vpop.eup %727  ;;  %v449_v63 = vmul.f32 %v726_v57, %v635_v42 }
 0x1e3   :  { %v730_v60 = vpop.eup %729  ;;  %v471_v61 = vsel %vm68_vm3, %v451_v58, 0.0  ;;  %v452_v62 = vmul.f32 %v728_v59, %v635_v42 }
 0x1e4   :  { %v450_v1 = vmul.f32 %v730_v60, %v635_v42  ;;  %v465_v2 = vsel %vm68_vm3, %v449_v63, 0.0 }
 0x1e5   :  { %472 = vadd.xlane.f32.xlu0 %v471_v61  ;;  %v474_v0 = vsel %vm68_vm3, %v452_v62, 0.0 }
 0x1e6   :  { %475 = vadd.xlane.f32.xlu1 %v474_v0  ;;  %v468_v3 = vsel %vm68_vm3, %v450_v1, 0.0 }
 0x1e9   :  { %466 = vadd.xlane.f32.xlu0 %v465_v2 }
 0x1ea   :  { %469 = vadd.xlane.f32.xlu1 %v468_v3 }
 0x1fb   :  { %514 = vrot.lane.b32.xlu1 %v834_v21, %s734_s17 }
 0x1ff   :  { %512 = vrot.lane.b32.xlu0 %v829_v20, %s734_s17 }
 0x269   :  { %v461_v11 = vpop.xlane.xlu1 %460 }
 0x26a   :  { %v486_v12 = vadd.f32 %v636_v10, %v461_v11  ;;  %v455_v13 = vpop.xlane.xlu0 %454 }
 0x26b   :  { %v484_v14 = vadd.f32 %v636_v10, %v455_v13 }
 0x26c   :  { %v526_v15 = vmul.f32 %v505_v5, %v486_v12 }
 0x26d   :  { %v524_v16 = vmul.f32 %v501_v7, %v484_v14  ;;  %v464_v17 = vpop.xlane.xlu1 %463 }
 0x26e   :  { %v547_v21 = vsel %vm532_vm4, %v526_v15, 0.0  ;;  %v487_v18 = vadd.f32 %v636_v10, %v464_v17  ;;  %v458_v19 = vpop.xlane.xlu0 %457 }
 0x26f   :  { %v548_v20 = vrot.slane %v547_v21, 4  ;;  %v533_v22 = vsel %vm532_vm4, %v524_v16, 0.0  ;;  %v485_v23 = vadd.f32 %v636_v10, %v458_v19 }
 0x270   :  { %v534_v24 = vrot.slane %v533_v22, 4  ;;  %v527_v25 = vmul.f32 %v507_v6, %v487_v18 }
 0x271   :  { %v549_v26 = vadd.f32 %v548_v20, %v547_v21  ;;  %v525_v27 = vmul.f32 %v503_v4, %v485_v23 }
 0x272   :  { %v535_v28 = vadd.f32 %v534_v24, %v533_v22  ;;  %v554_v29 = vsel %vm532_vm4, %v527_v25, 0.0  ;;  %v473_v30 = vpop.xlane.xlu0 %472 }
 0x273   :  { %v555_v31 = vrot.slane %v554_v29, 4  ;;  %v540_v32 = vsel %vm532_vm4, %v525_v27, 0.0  ;;  %v476_v33 = vpop.xlane.xlu1 %475  ;;  %v550_v36 = vrot.slane %v549_v26, 2  ;;  %v490_v47 = vadd.f32 %v636_v10, %v473_v30 }
 0x274   :  { %v536_v34 = vrot.slane %v535_v28, 2  ;;  %v541_v35 = vrot.slane %v540_v32, 4  ;;  %v491_v50 = vadd.f32 %v636_v10, %v476_v33 }
 0x275   :  { %v556_v37 = vadd.f32 %v555_v31, %v554_v29  ;;  %v551_v45 = vadd.f32 %v550_v36, %v549_v26 }
 0x276   :  { %v542_v38 = vadd.f32 %v541_v35, %v540_v32  ;;  %v467_v39 = vpop.xlane.xlu0 %466  ;;  %v537_v40 = vadd.f32 %v536_v34, %v535_v28 }
 0x277   :  { %v488_v41 = vadd.f32 %v636_v10, %v467_v39  ;;  %v470_v42 = vpop.xlane.xlu1 %469  ;;  %v557_v46 = vrot.slane %v556_v37, 2  ;;  %v552_v61 = vrot.slane %v551_v45, 1 }
 0x278   :  { %v543_v43 = vrot.slane %v542_v38, 2  ;;  %v489_v44 = vadd.f32 %v636_v10, %v470_v42  ;;  %v538_v53 = vrot.slane %v537_v40, 1 }
 0x279   :  { %v528_v48 = vmul.f32 %v509_v9, %v488_v41  ;;  %v558_v62 = vadd.f32 %v557_v46, %v556_v37  ;;  %v553_v14 = vadd.f32 %v552_v61, %v551_v45 }
 0x27a   :  { %v544_v49 = vadd.f32 %v543_v43, %v542_v38  ;;  %v529_v51 = vmul.f32 %v511_v8, %v489_v44  ;;  %v513_v52 = vpop.permute.xlu0 %512  ;;  %v539_v5 = vadd.f32 %v538_v53, %v537_v40 }
 0x27b   :  { %v561_v54 = vsel %vm532_vm4, %v528_v48, 0.0  ;;  %v530_v55 = vmul.f32 %v513_v52, %v490_v47  ;;  %v515_v56 = vpop.permute.xlu1 %514  ;;  %v559_v10 = vrot.slane %v558_v62, 1 }
 0x27c   :  { %v545_v57 = vrot.slane %v544_v49, 1  ;;  %v562_v58 = vrot.slane %v561_v54, 4  ;;  %v568_v59 = vsel %vm532_vm4, %v529_v51, 0.0  ;;  %v531_v60 = vmul.f32 %v515_v56, %v491_v50 }
 0x27d   :  { %v569_v63 = vrot.slane %v568_v59, 4  ;;  %v575_v0 = vsel %vm532_vm4, %v530_v55, 0.0  ;;  %v560_v22 = vadd.f32 %v559_v10, %v558_v62 }
 0x27e   :  { %v546_v1 = vadd.f32 %v545_v57, %v544_v49  ;;  %v563_v2 = vadd.f32 %v562_v58, %v561_v54  ;;  %v576_v3 = vrot.slane %v575_v0, 4  ;;  %v582_v4 = vsel %vm532_vm4, %v531_v60, 0.0 }
 0x27f   :  { %v570_v6 = vadd.f32 %v569_v63, %v568_v59  ;;  %v583_v7 = vrot.slane %v582_v4, 4 }
 0x280   :  { %v564_v8 = vrot.slane %v563_v2, 2  ;;  %v577_v9 = vadd.f32 %v576_v3, %v575_v0  ;;  %v598_v11 = vsel %vm597_vm5, %v546_v1, %v539_v5 }
 0x281   :  { %v571_v12 = vrot.slane %v570_v6, 2  ;;  %v584_v13 = vadd.f32 %v583_v7, %v582_v4  ;;  %v600_v18 = vsel %vm599_vm6, %v553_v14, %v598_v11 }
 0x282   :  { %v565_v15 = vadd.f32 %v564_v8, %v563_v2  ;;  %v578_v16 = vrot.slane %v577_v9, 2  ;;  %v602_v27 = vsel %vm601_vm7, %v560_v22, %v600_v18 }
 0x283   :  { %v572_v17 = vadd.f32 %v571_v12, %v570_v6  ;;  %v585_v21 = vrot.slane %v584_v13, 2 }
 0x284   :  { %v566_v19 = vrot.slane %v565_v15, 1  ;;  %v579_v20 = vadd.f32 %v578_v16, %v577_v9 }
 0x285   :  { %v573_v23 = vrot.slane %v572_v17, 1  ;;  %v586_v24 = vadd.f32 %v585_v21, %v584_v13 }
 0x286   :  { %v567_v25 = vadd.f32 %v566_v19, %v565_v15  ;;  %v580_v26 = vrot.slane %v579_v20, 1 }
 0x287   :  { %v574_v28 = vadd.f32 %v573_v23, %v572_v17  ;;  %v587_v29 = vrot.slane %v586_v24, 1 }
 0x288   :  { %v604_v30 = vsel %vm603_vm8, %v567_v25, %v602_v27  ;;  %v581_v31 = vadd.f32 %v580_v26, %v579_v20 }
 0x289   :  { %v606_v32 = vsel %vm605_vm9, %v574_v28, %v604_v30  ;;  %v588_v33 = vadd.f32 %v587_v29, %v586_v24 }
 0x28a   :  { %v608_v34 = vsel %vm607_vm10, %v581_v31, %v606_v32 }
 0x28b   :  { %v610_v35 = vsel %vm609_vm11, %v588_v33, %v608_v34 }
 0x28c   :  { %612 = vst.msk [vmem:[%s901_s9] sm:$0xff] %vm532_vm4, %v610_v35 }

// kernel: rgprec_forward.4
= control target key start
LH: loop header
LB: loop body
LE: loop exit
PB: predicated region body
PF: predicated region fallthrough
CT: control target
= control target key end

     0   :  { %v1269_v1 = vmov 0   ;;  %vm93_vm0 = vcmask 261120   ;;  %vm199_vm1 = vcmask 1040384   ;;  %vm186_vm2 = vcmask 269312   ;;  %s1621_s4 = inlined_call_operand.vmem [shape: bf16[32,32], index: 4, kind: input, shape index: {}]   ;;  %s1622_s1 = inlined_call_operand.vmem [shape: f32[8,8,32], index: 1, kind: input, shape index: {}]   ;;  %s1623_s3 = inlined_call_operand.vmem [shape: bf16[33,32], index: 3, kind: input, shape index: {}]   ;;  %s1624_s0 = inlined_call_operand.vmem [shape: f32[8,8,33], index: 0, kind: input, shape index: {}]   ;;  %s1625_s6 = inlined_call_operand.vmem [shape: bf16[32,64], index: 6, kind: input, shape index: {}]   ;;  %s1626_s8 = inlined_call_operand.vmem [shape: bf16[32,32], index: 8, kind: input, shape index: {}]   ;;  %s1627_s5 = inlined_call_operand.vmem [shape: f32[1,32], index: 5, kind: input, shape index: {}]   ;;  %s1628_s2 = inlined_call_operand.vmem [shape: f32[8,32], index: 2, kind: input, shape index: {}]   ;;  %s1629_s9 = inlined_call_operand.vmem [shape: f32[1,1,32], index: 9, kind: input, shape index: {}]   ;;  %s1630_s7 = inlined_call_operand.vmem [shape: f32[1,64], index: 7, kind: input, shape index: {}]   ;;  %s1631_s10 = inlined_call_operand.<no memory space> [shape: f32[1,1], index: 10, kind: input, shape index: {}]   ;;  %s1632_s11 = inlined_call_operand.vmem [shape: bf16[32,32], index: 11, kind: input, shape index: {}]   ;;  %s1633_s12 = inlined_call_operand.vmem [shape: f32[1,32], index: 12, kind: input, shape index: {}]   ;;  %s1634_s13 = inlined_call_operand.vmem [shape: f32[8,32], index: 13, kind: output, shape index: {}]  }
   0x1   :  { %v1208_v0 = vld [vmem:[%s1621_s4] sm:$0xff]   ;;  %1206 = vset.pattern.permute.xlu1 %v1269_v1  ;;  %1207 = vset.pattern.permute.xlu0 %v1269_v1  ;;  %v1209_v2 = vld [vmem:[%s1621_s4 + $0x8] sm:$0xff]   ;;  %v57_v5 = vld [vmem:[%s1622_s1 + $0x10] sm:$0xff]  ;;  %v201_v15 = vsel %vm199_vm1, 65535, %v1269_v1  ;;  %v1270_v34 = vmov 0.0   ;;  %vm1271_vm3 = vmmov 0  }
   0x2   :  { %1138 = vmatprep.subr.bf16.mxu0 %v1208_v0  ;;  %v55_v3 = vld [vmem:[%s1622_s1] sm:$0xff]  ;;  %v56_v4 = vld [vmem:[%s1622_s1 + $0x8] sm:$0xff]  ;;  %v58_v7 = vld [vmem:[%s1622_s1 + $0x18] sm:$0xff]  ;;  %s1272_s4 = smov 32   ;;  %vm667_vm4 = vcmask 7168   ;;  %vm1007_vm5 = vcmask 1041409  }
   0x3   :  { %1139 = vmatpush3.bf16.msra.mxu0 %v1208_v0  ;;  %v73_v6 = vpack.c.bf16 %v56_v4, %v55_v3  ;;  %v1210_v8 = vld [vmem:[%s1623_s3] sm:$0xff]   ;;  %v60_v10 = vld [vmem:[%s1622_s1 + $0x28] sm:$0xff]  ;;  %v74_v11 = vpack.c.bf16 %v58_v7, %v57_v5  ;;  %v1212_v14 = vld [vmem:[%s1623_s3 + $0x10] ss:$0 sps:$4 sm:$0x11]   ;;  %vm1009_vm6 = vcmask 1042434  }
   0x4   :  { %1140 = vmatprep.subr.bf16.mxu0 %v1209_v2  ;;  %v59_v9 = vld [vmem:[%s1622_s1 + $0x20] sm:$0xff]  ;;  %v1211_v13 = vld [vmem:[%s1623_s3 + $0x8] sm:$0xff]   ;;  %v61_v16 = vld [vmem:[%s1622_s1 + $0x30] sm:$0xff]  ;;  %v203_v18 = vand.u32 %v1212_v14, %v201_v15  ;;  %vm1011_vm7 = vcmask 1043459   ;;  %vm1013_vm8 = vcmask 1044484   ;;  %vm1015_vm9 = vcmask 1045509  }
   0x5   :  { %1142 = vmatprep.mubr.msk.bf16.mxu0 %vm93_vm0, %v73_v6  ;;  %v75_v12 = vpack.c.bf16 %v60_v10, %v59_v9  ;;  %v62_v17 = vld [vmem:[%s1622_s1 + $0x38] sm:$0xff]  ;;  %v1390_v19 = vld [vmem:[%s1624_s0] sm:$0xff]  ;;  %v1395_v20 = vld [vmem:[%s1624_s0 + $0x8] sm:$0xff]  ;;  %v1273_v9 = vmov 1966171168   ;;  %vm1017_vm10 = vcmask 1046534  }
   0x6   :  { %v76_v21 = vpack.c.bf16 %v62_v17, %v61_v16  ;;  %v64_v22 = vpack.c.bf16 %v1395_v20, %v1390_v19  ;;  %v1403_v23 = vld [vmem:[%s1624_s0 + $0x10] sm:$0xff]  ;;  %v1408_v24 = vld [vmem:[%s1624_s0 + $0x18] sm:$0xff]  ;;  %v1413_v25 = vld [vmem:[%s1624_s0 + $0x20] sm:$0xff]  ;;  %v460_v10 = vunpack.c.l.s4 %v1273_v9  ;;  %vm1019_vm11 = vcmask 1047559  }
   0x7   :  { %1141 = vmatpush3.bf16.msra.mxu0 %v1209_v2  ;;  %v1418_v26 = vld [vmem:[%s1624_s0 + $0x28] sm:$0xff]  ;;  %v65_v27 = vpack.c.bf16 %v1408_v24, %v1403_v23  ;;  %v1427_v29 = vld [vmem:[%s1624_s0 + $0x30] sm:$0xff]  ;;  %v1432_v30 = vld [vmem:[%s1624_s0 + $0x38] sm:$0xff] }
   0x8   :  { %1150 = vmatprep.subr.bf16.mxu0 %v1210_v8  ;;  %v66_v28 = vpack.c.bf16 %v1418_v26, %v1413_v25  ;;  %v67_v31 = vpack.c.bf16 %v1432_v30, %v1427_v29  ;;  %v1213_v32 = vld [vmem:[%s1625_s6] sm:$0xff]   ;;  %v1214_v33 = vld [vmem:[%s1625_s6 + $0x8] sm:$0xff]   ;;  %v461_v14 = vunpack.c.0.s8 %v460_v10 }
   0x9   :  { %1164 = vmatprep.subr.bf16.mxu1 %v1213_v32  ;;  %v1096_v35 = vld [vmem:[%s1627_s5] ss:$0 sm:$0xff]  ;;  %v1216_v60 = vld [vmem:[%s1626_s8 + $0x8] sm:$0xff]  }
   0xa   :  { %1143 = vmatmul.mubr.msk.bf16.vlgmr.msra.gmra.mrb[0].mxu0 %vm93_vm0, %v74_v11  ;;  %1165 = vmatpush3.bf16.msra.mxu1 %v1213_v32  ;;  %v1215_v58 = vld [vmem:[%s1626_s8] sm:$0xff]   ;;  %v462_v11 = vlaneseq }
   0xb   :  { %1151 = vmatpush3.bf16.msra.mxu0 %v1210_v8  ;;  %1146 = vmatprep.mubr.msk.bf16.mxu0 %vm93_vm0, %v75_v12  ;;  %v63_v2 = vld [vmem:[%s1628_s2] sm:$0xff] }
   0xc   :  { %1152 = vmatprep.subr.bf16.mxu0 %v1211_v13  ;;  %1166 = vmatprep.subr.bf16.mxu1 %v1214_v33  ;;  %v397_v3 = vpack.c.bf16 %v63_v2, %v63_v2  ;;  %v1107_v4 = vld [vmem:[%s1629_s9] ss:$0 sm:$0xff]  ;;  %v463_v15 = vshrl.u32 %v462_v11, 7 }
   0xd   :  { %585 = vrot.lane.b32.xlu0 %v1107_v4, %s1272_s4 }
   0xe   :  { %1167 = vmatpush3.bf16.msra.mxu1 %v1214_v33 }
   0xf   :  { %1153 = vmatpush3.bf16.msra.mxu0 %v1211_v13  ;;  %1176 = vmatprep.subr.bf16.mxu1 %v1270_v34 }
  0x10   :  { %1154 = vmatprep.subr.bf16.mxu0 %v203_v18 }
  0x12   :  { %1147 = vmatmul.mubr.msk.bf16.gmra.mrb[4].mxu0 %vm93_vm0, %v76_v21 }
  0x13   :  { %1155 = vmatpush3.bf16.msra.mxu0 %v203_v18  ;;  %1156 = vmatprep.mubr.msk.bf16.mxu0 %vm186_vm2, %v64_v22  ;;  %v464_v18 = vsub.s32 %v461_v14, %v463_v15 }
  0x1a   :  { %1157 = vmatmul.mubr.msk.bf16.vlgmr.msra.gmra.mrb[0].mxu0 %vm186_vm2, %v65_v27 }
  0x1b   :  { %1160 = vmatprep.mubr.msk.bf16.mxu0 %vm186_vm2, %v66_v28  ;;  %v509_v28 = vsub.s32 0, %v463_v15 }
  0x22   :  { %1161 = vmatmul.mubr.msk.bf16.gmra.mrb[4].mxu0 %vm186_vm2, %v67_v31 }
  0xed   :  { %v1158_v36 = vpop.f32.mrb[0].mxu0 }
  0xee   :  { %v279_v37 = vadd.f32 %v1158_v36, %v1096_v35  ;;  %v239_v38 = vpop.f32.mrb[1].mxu0 }
  0xef   :  { %v277_v39 = vadd.f32 %v1096_v35, %v239_v38  ;;  %v1159_v40 = vpop.f32.mrb[2].mxu0 }
  0xf0   :  { %1219 = vtanh.f32 %v279_v37  ;;  %v280_v41 = vadd.f32 %v1159_v40, %v1096_v35  ;;  %v242_v42 = vpop.f32.mrb[3].mxu0 }
  0xf1   :  { %1221 = vtanh.f32 %v277_v39  ;;  %v278_v43 = vadd.f32 %v1096_v35, %v242_v42 }
  0xf2   :  { %1223 = vtanh.f32 %v280_v41 }
  0xf3   :  { %1225 = vtanh.f32 %v278_v43 }
  0xf5   :  { %v1162_v44 = vpop.f32.mrb[4].mxu0 }
  0xf6   :  { %v283_v45 = vadd.f32 %v1162_v44, %v1096_v35  ;;  %v255_v46 = vpop.f32.mrb[5].mxu0 }
  0xf7   :  { %v281_v47 = vadd.f32 %v1096_v35, %v255_v46  ;;  %v1163_v48 = vpop.f32.mrb[6].mxu0 }
  0xf8   :  { %1227 = vtanh.f32 %v283_v45  ;;  %v284_v49 = vadd.f32 %v1163_v48, %v1096_v35  ;;  %v258_v50 = vpop.f32.mrb[7].mxu0 }
  0xf9   :  { %1229 = vtanh.f32 %v281_v47  ;;  %v282_v51 = vadd.f32 %v1096_v35, %v258_v50 }
  0xfa   :  { %v1220_v52 = vpop.eup %1219  ;;  %1231 = vtanh.f32 %v284_v49 }
  0xfb   :  { %v1222_v53 = vpop.eup %1221  ;;  %1233 = vtanh.f32 %v282_v51 }
  0xfc   :  { %v1224_v54 = vpop.eup %1223 }
  0xfd   :  { %v1226_v55 = vpop.eup %1225  ;;  %v294_v56 = vpack.c.bf16 %v1224_v54, %v1220_v52  ;;  %v586_v54 = vpop.permute.xlu0 %585 }
  0xfe   :  { %v293_v57 = vpack.c.bf16 %v1226_v55, %v1222_v53  ;;  %v1097_v55 = vld [vmem:[%s1630_s7] ss:$0 sm:$0xff]  ;;  %s1274_s7 = smov 96  }
 0x100   :  { %1168 = vmatprep.mubr.msk.bf16.mxu1 %vm93_vm0, %v293_v57 }
 0x101   :  { %1169 = vmatmul.mubr.msk.bf16.vlgmr.msra.gmra.mrb[0].mxu1 %vm93_vm0, %v294_v56 }
 0x102   :  { %v1228_v59 = vpop.eup %1227  ;;  %1177 = vmatpush3.bf16.msra.mxu1 %v1215_v58 }
 0x103   :  { %v1230_v61 = vpop.eup %1229  ;;  %1178 = vmatprep.subr.bf16.mxu1 %v1270_v34 }
 0x104   :  { %v1232_v62 = vpop.eup %1231 }
 0x105   :  { %v1234_v63 = vpop.eup %1233  ;;  %v296_v0 = vpack.c.bf16 %v1232_v62, %v1228_v59 }
 0x106   :  { %v295_v1 = vpack.c.bf16 %v1234_v63, %v1230_v61  ;;  %1179 = vmatpush3.bf16.msra.mxu1 %v1216_v60 }
 0x107   :  { %1184 = vmatprep.subr.bf16.mxu1 %v1270_v34 }
 0x108   :  { %1172 = vmatprep.mubr.msk.bf16.mxu1 %vm93_vm0, %v295_v1 }
 0x109   :  { %1173 = vmatmul.mubr.msk.bf16.gmra.mrb[4].mxu1 %vm93_vm0, %v296_v0 }
 0x10a   :  { %1180 = vmatprep.mubr.msk.bf16.mxu1 %vm1271_vm3, %v1270_v34 }
 0x111   :  { %1181 = vmatmul.mubr.msk.bf16.vlgmr.msra.gmra.mrb[8].mxu1 %vm93_vm0, %v397_v3 }
 0x112   :  { %1188 = vmatprep.mubr.msk.bf16.mxu1 %vm1271_vm3, %v1270_v34 }
 0x1d4   :  { %v1170_v5 = vpop.f32.mrb[0].mxu1 }
 0x1d5   :  { %v366_v6 = vpop.f32.mrb[1].mxu1  ;;  %v1486_v59 = vadd.f32 %v1170_v5, %v1097_v55 }
 0x1d6   :  { %v1171_v7 = vpop.f32.mrb[2].mxu1  ;;  %v1483_v56 = vadd.f32 %v1097_v55, %v366_v6 }
 0x1d7   :  { %v369_v8 = vpop.f32.mrb[3].mxu1  ;;  %v1492_v3 = vadd.f32 %v1171_v7, %v1097_v55 }
 0x1d8   :  { %v1488_v60 = vadd.f32 %v1097_v55, %v369_v8 }
 0x1dc   :  { %v1468_v12 = vpop.f32.mrb[4].mxu1 }
 0x1dd   :  { %v382_v13 = vpop.f32.mrb[5].mxu1 }
 0x1de   :  { %v1470_v16 = vpop.f32.mrb[6].mxu1  ;;  %v1494_v6 = vadd.f32 %v1097_v55, %v382_v13 }
 0x1df   :  { %v385_v17 = vpop.f32.mrb[7].mxu1  ;;  %v1502_v7 = vadd.f32 %v1470_v16, %v1097_v55 }
 0x1e4   :  { %v451_v21 = vpop.f32.mrb[8].mxu1 }
 0x1e5   :  { %v458_v22 = vcombine.high %v451_v21, %v451_v21  ;;  %v465_v27 = vrot.slane %v451_v21, %v464_v18  ;;  %v1182_v31 = vpop.f32.mrb[9].mxu1 }
 0x1e6   :  { %v454_v32 = vpop.f32.mrb[10].mxu1 }
 0x1e7   :  { %v472_v33 = vrot.slane %v458_v22, %v464_v18  ;;  %v473_v35 = vcombine.high %v465_v27, %v465_v27  ;;  %v481_v36 = vrot.slane %v465_v27, %v464_v18  ;;  %v1183_v37 = vpop.f32.mrb[11].mxu1 }
 0x1e9   :  { %v474_v38 = vcombine.high %v472_v33, %v472_v33  ;;  %v495_v39 = vrot.slane %v473_v35, %v464_v18  ;;  %v510_v40 = vrot.slane %v481_v36, %v509_v28  ;;  %v503_v41 = vcombine.high %v481_v36, %v481_v36 }
 0x1ea   :  { %v488_v44 = vrot.slane %v472_v33, %v464_v18 }
 0x1eb   :  { %539 = vrot.lane.b32.xlu0 %v510_v40, %s1272_s4  ;;  %v518_v42 = vrot.slane %v503_v41, %v509_v28  ;;  %v505_v43 = vcombine.high %v495_v39, %v495_v39  ;;  %v514_v45 = vrot.slane %v495_v39, %v509_v28  ;;  %v502_v46 = vrot.slane %v474_v38, %v464_v18 }
 0x1ec   :  { %v526_v48 = vrot.slane %v488_v44, %v509_v28  ;;  %v504_v51 = vcombine.high %v488_v44, %v488_v44  ;;  %v1499_v18 = vadd.f32 %v1097_v55, %v385_v17  ;;  %v1509_v17 = vadd.f32 %v1468_v12, %v1097_v55 }
 0x1ed   :  { %543 = vrot.lane.b32.xlu1 %v518_v42, %s1272_s4  ;;  %v522_v47 = vrot.slane %v505_v43, %v509_v28  ;;  %v506_v49 = vcombine.high %v502_v46, %v502_v46  ;;  %v530_v50 = vrot.slane %v502_v46, %v509_v28  ;;  %v18_v12 = vstv %s1631_s10 }
 0x1ee   :  { %v534_v53 = vrot.slane %v504_v51, %v509_v28  ;;  %19 = vst [vmem:[#allocation2] sm:$0x1] %v18_v12 }
 0x1ef   :  { %541 = vrot.lane.b32.xlu0 %v514_v45, %s1272_s4  ;;  %v538_v52 = vrot.slane %v506_v49, %v509_v28 }
 0x1f1   :  { %545 = vrot.lane.b32.xlu1 %v522_v47, %s1272_s4 }
 0x1f3   :  { %547 = vrot.lane.b32.xlu0 %v526_v48, %s1272_s4 }
 0x1f5   :  { %549 = vrot.lane.b32.xlu1 %v530_v50, %s1272_s4 }
 0x1f7   :  { %553 = vrot.lane.b32.xlu0 %v538_v52, %s1272_s4 }
 0x1f9   :  { %551 = vrot.lane.b32.xlu1 %v534_v53, %s1272_s4 }
 0x25d   :  { %v540_v57 = vpop.permute.xlu0 %539 }
 0x25e   :  { %v563_v58 = vadd.f32 %v540_v57, %v1483_v56 }
 0x25f   :  { %v544_v62 = vpop.permute.xlu1 %543 }
 0x260   :  { %v571_v61 = vmax.f32 %v563_v58, 0.0  ;;  %v565_v63 = vadd.f32 %v544_v62, %v1486_v59 }
 0x261   :  { %v542_v0 = vpop.permute.xlu0 %541 }
 0x262   :  { %v588_v1 = vmul.f32 %v586_v54, %v571_v61  ;;  %v564_v2 = vadd.f32 %v542_v0, %v1488_v60  ;;  %v573_v4 = vmax.f32 %v565_v63, 0.0 }
 0x263   :  { %v546_v10 = vpop.permute.xlu1 %545 }
 0x264   :  { %v572_v9 = vmax.f32 %v564_v2, 0.0  ;;  %604 = vrot.lane.b32.xlu1 %v588_v1, %s1274_s7  ;;  %v566_v5 = vadd.f32 %v546_v10, %v1492_v3  ;;  %v590_v11 = vmul.f32 %v586_v54, %v573_v4 }
 0x265   :  { %v548_v8 = vpop.permute.xlu0 %547 }
 0x266   :  { %v589_v14 = vmul.f32 %v586_v54, %v572_v9  ;;  %v567_v15 = vadd.f32 %v548_v8, %v1494_v6  ;;  %v574_v21 = vmax.f32 %v566_v5, 0.0 }
 0x267   :  { %v550_v22 = vpop.permute.xlu1 %549 }
 0x268   :  { %v575_v13 = vmax.f32 %v567_v15, 0.0  ;;  %608 = vrot.lane.b32.xlu1 %v590_v11, %s1274_s7  ;;  %606 = vrot.lane.b32.xlu0 %v589_v14, %s1274_s7  ;;  %v568_v27 = vadd.f32 %v550_v22, %v1499_v18  ;;  %v591_v31 = vmul.f32 %v586_v54, %v574_v21 }
 0x269   :  { %v554_v28 = vpop.permute.xlu0 %553 }
 0x26a   :  { %v592_v32 = vmul.f32 %v586_v54, %v575_v13  ;;  %v570_v33 = vadd.f32 %v554_v28, %v1502_v7  ;;  %v576_v35 = vmax.f32 %v568_v27, 0.0 }
 0x26b   :  { %v552_v36 = vpop.permute.xlu1 %551 }
 0x26c   :  { %610 = vrot.lane.b32.xlu0 %v591_v31, %s1274_s7  ;;  %612 = vrot.lane.b32.xlu1 %v592_v32, %s1274_s7  ;;  %v569_v16 = vadd.f32 %v552_v36, %v1509_v17  ;;  %v593_v37 = vmul.f32 %v586_v54, %v576_v35  ;;  %v578_v38 = vmax.f32 %v570_v33, 0.0 }
 0x26e   :  { %v577_v39 = vmax.f32 %v569_v16, 0.0  ;;  %v595_v41 = vmul.f32 %v586_v54, %v578_v38 }
 0x270   :  { %614 = vrot.lane.b32.xlu0 %v593_v37, %s1274_s7  ;;  %v594_v40 = vmul.f32 %v586_v54, %v577_v39 }
 0x272   :  { %616 = vrot.lane.b32.xlu1 %v594_v40, %s1274_s7 }
 0x274   :  { %618 = vrot.lane.b32.xlu0 %v595_v41, %s1274_s7 }
 0x2d6   :  { %v605_v42 = vpop.permute.xlu1 %604 }
 0x2d7   :  { %v628_v43 = vsel %vm93_vm0, %v605_v42, 0.0 }
 0x2d8   :  { %629 = vadd.xlane.f32.xlu1 %v628_v43 }
 0x2da   :  { %v609_v44 = vpop.permute.xlu1 %608  ;;  %v607_v45 = vpop.permute.xlu0 %606 }
 0x2db   :  { %v631_v46 = vsel %vm93_vm0, %v607_v45, 0.0  ;;  %v634_v48 = vsel %vm93_vm0, %v609_v44, 0.0 }
 0x2dc   :  { %632 = vadd.xlane.f32.xlu0 %v631_v46 }
 0x2de   :  { %v611_v47 = vpop.permute.xlu0 %610  ;;  %v613_v50 = vpop.permute.xlu1 %612 }
 0x2df   :  { %v637_v49 = vsel %vm93_vm0, %v611_v47, 0.0  ;;  %v640_v53 = vsel %vm93_vm0, %v613_v50, 0.0 }
 0x2e0   :  { %635 = vadd.xlane.f32.xlu0 %v634_v48  ;;  %638 = vadd.xlane.f32.xlu1 %v637_v49 }
 0x2e2   :  { %v615_v51 = vpop.permute.xlu0 %614 }
 0x2e3   :  { %v643_v52 = vsel %vm93_vm0, %v615_v51, 0.0 }
 0x2e4   :  { %644 = vadd.xlane.f32.xlu1 %v643_v52  ;;  %641 = vadd.xlane.f32.xlu0 %v640_v53  ;;  %v617_v54 = vpop.permute.xlu1 %616 }
 0x2e5   :  { %v646_v55 = vsel %vm93_vm0, %v617_v54, 0.0 }
 0x2e6   :  { %v619_v57 = vpop.permute.xlu0 %618 }
 0x2e7   :  { %v649_v58 = vsel %vm93_vm0, %v619_v57, 0.0 }
 0x2e8   :  { %647 = vadd.xlane.f32.xlu0 %v646_v55 }
 0x2f5   :  { %758 = vrot.lane.b32.xlu1 %v1395_v20, %s1274_s7 }
 0x2fe   :  { %756 = vrot.lane.b32.xlu0 %v1390_v19, %s1274_s7  ;;  %v1544_v19 = vld [vmem:[#allocation2] ss:$0 sm:$0xff] }
 0x302   :  { %762 = vrot.lane.b32.xlu0 %v1408_v24, %s1274_s7 }
 0x306   :  { %766 = vrot.lane.b32.xlu0 %v1418_v26, %s1274_s7 }
 0x30a   :  { %770 = vrot.lane.b32.xlu0 %v1432_v30, %s1274_s7 }
 0x319   :  { %650 = vadd.xlane.f32.xlu1 %v649_v58 }
 0x32a   :  { %760 = vrot.lane.b32.xlu1 %v1403_v23, %s1274_s7 }
 0x32e   :  { %764 = vrot.lane.b32.xlu1 %v1413_v25, %s1274_s7 }
 0x332   :  { %768 = vrot.lane.b32.xlu1 %v1427_v29, %s1274_s7 }
 0x365   :  { %v630_v20 = vpop.xlane.xlu1 %629 }
 0x366   :  { %v659_v24 = vadd.f32 %v1544_v19, %v630_v20 }
 0x368   :  { %v668_v26 = vsel %vm667_vm4, %v659_v24, -inf }
 0x369   :  { %v669_v30 = vrot.slane %v668_v26, 4  ;;  %v633_v61 = vpop.xlane.xlu0 %632 }
 0x36a   :  { %v660_v62 = vadd.f32 %v1544_v19, %v633_v61 }
 0x36b   :  { %v670_v63 = vmax.f32 %v668_v26, %v669_v30 }
 0x36c   :  { %v675_v23 = vsel %vm667_vm4, %v660_v62, -inf }
 0x36d   :  { %v671_v0 = vrot.slane %v670_v63, 2  ;;  %v676_v25 = vrot.slane %v675_v23, 4  ;;  %v639_v1 = vpop.xlane.xlu1 %638  ;;  %v636_v8 = vpop.xlane.xlu0 %635 }
 0x36e   :  { %v662_v29 = vadd.f32 %v1544_v19, %v639_v1  ;;  %v1555_v37 = vadd.f32 %v1544_v19, %v636_v8 }
 0x36f   :  { %v672_v2 = vmax.f32 %v670_v63, %v671_v0  ;;  %v677_v4 = vmax.f32 %v675_v23, %v676_v25 }
 0x370   :  { %v689_v9 = vsel %vm667_vm4, %v662_v29, -inf  ;;  %v682_v42 = vsel %vm667_vm4, %v1555_v37, -inf }
 0x371   :  { %v673_v10 = vrot.slane %v672_v2, 1  ;;  %v678_v5 = vrot.slane %v677_v4, 2  ;;  %v690_v11 = vrot.slane %v689_v9, 4  ;;  %v645_v14 = vpop.xlane.xlu1 %644  ;;  %v642_v16 = vpop.xlane.xlu0 %641  ;;  %v683_v47 = vrot.slane %v682_v42, 4 }
 0x372   :  { %v664_v15 = vadd.f32 %v1544_v19, %v645_v14  ;;  %v1560_v44 = vadd.f32 %v1544_v19, %v642_v16 }
 0x373   :  { %v674_v21 = vmax.f32 %v672_v2, %v673_v10  ;;  %v679_v13 = vmax.f32 %v677_v4, %v678_v5  ;;  %v691_v22 = vmax.f32 %v689_v9, %v690_v11  ;;  %v684_v54 = vmax.f32 %v682_v42, %v683_v47 }
 0x374   :  { %v703_v27 = vsel %vm667_vm4, %v664_v15, -inf  ;;  %v696_v49 = vsel %vm667_vm4, %v1560_v44, -inf }
 0x375   :  { %v724_v28 = vsub.f32 %v659_v24, %v674_v21  ;;  %v680_v31 = vrot.slane %v679_v13, 1  ;;  %v692_v32 = vrot.slane %v691_v22, 2  ;;  %v704_v33 = vrot.slane %v703_v27, 4  ;;  %v648_v46 = vpop.xlane.xlu0 %647  ;;  %v759_v61 = vpop.permute.xlu1 %758 }
 0x376   :  { %v1565_v51 = vadd.f32 %v1544_v19, %v648_v46  ;;  %v697_v55 = vrot.slane %v696_v49, 4  ;;  %v685_v63 = vrot.slane %v684_v54, 2 }
 0x377   :  { %v732_v35 = vmul.f32 1.442695, %v724_v28  ;;  %v681_v36 = vmax.f32 %v679_v13, %v680_v31  ;;  %v705_v38 = vmax.f32 %v703_v27, %v704_v33  ;;  %v693_v40 = vmax.f32 %v691_v22, %v692_v32 }
 0x378   :  { %v710_v24 = vsel %vm667_vm4, %v1565_v51, -inf  ;;  %v698_v23 = vmax.f32 %v696_v49, %v697_v55  ;;  %v686_v5 = vmax.f32 %v684_v54, %v685_v63 }
 0x379   :  { %1235 = vpow2.f32 %v732_v35  ;;  %v725_v39 = vsub.f32 %v660_v62, %v681_v36  ;;  %v706_v41 = vrot.slane %v705_v38, 2  ;;  %v694_v43 = vrot.slane %v693_v40, 1  ;;  %v757_v52 = vpop.permute.xlu0 %756 }
 0x37a   :  { %v711_v0 = vrot.slane %v710_v24, 4  ;;  %v699_v8 = vrot.slane %v698_v23, 2  ;;  %v687_v28 = vrot.slane %v686_v5, 1 }
 0x37b   :  { %v734_v12 = vmul.f32 1.442695, %v725_v39  ;;  %v707_v45 = vmax.f32 %v705_v38, %v706_v41  ;;  %v695_v48 = vmax.f32 %v693_v40, %v694_v43 }
 0x37c   :  { %v712_v11 = vmax.f32 %v710_v24, %v711_v0  ;;  %v700_v31 = vmax.f32 %v698_v23, %v699_v8  ;;  %v688_v16 = vmax.f32 %v686_v5, %v687_v28 }
 0x37d   :  { %1237 = vpow2.f32 %v734_v12  ;;  %v708_v50 = vrot.slane %v707_v45, 1  ;;  %v727_v58 = vsub.f32 %v662_v29, %v695_v48  ;;  %v763_v41 = vpop.permute.xlu0 %762 }
 0x37e   :  { %v713_v32 = vrot.slane %v712_v11, 2  ;;  %v701_v38 = vrot.slane %v700_v31, 1  ;;  %v726_v43 = vsub.f32 %v1555_v37, %v688_v16 }
 0x37f   :  { %v709_v20 = vmax.f32 %v707_v45, %v708_v50  ;;  %v738_v1 = vmul.f32 1.442695, %v727_v58 }
 0x380   :  { %v714_v39 = vmax.f32 %v712_v11, %v713_v32  ;;  %v702_v45 = vmax.f32 %v700_v31, %v701_v38  ;;  %v736_v50 = vmul.f32 1.442695, %v726_v43 }
 0x381   :  { %v729_v2 = vsub.f32 %v664_v15, %v709_v20  ;;  %1239 = vpow2.f32 %v738_v1  ;;  %v767_v49 = vpop.permute.xlu0 %766 }
 0x382   :  { %v715_v46 = vrot.slane %v714_v39, 1 }
 0x383   :  { %v1236_v53 = vpop.eup %1235  ;;  %v742_v14 = vmul.f32 1.442695, %v729_v2 }
 0x384   :  { %v780_v57 = vmul.f32 %v1236_v53, %v757_v52  ;;  %v728_v52 = vsub.f32 %v1560_v44, %v702_v45  ;;  %v716_v53 = vmax.f32 %v714_v39, %v715_v46 }
 0x385   :  { %1241 = vpow2.f32 %v742_v14 }
 0x386   :  { %v788_v26 = vsel %vm667_vm4, %v780_v57, 0.0  ;;  %v740_v20 = vmul.f32 1.442695, %v728_v52  ;;  %v730_v37 = vsub.f32 %v1565_v51, %v716_v53 }
 0x387   :  { %v1238_v30 = vpop.eup %1237  ;;  %v789_v62 = vrot.slane %v788_v26, 4 }
 0x388   :  { %v781_v25 = vmul.f32 %v1238_v30, %v759_v61  ;;  %v744_v44 = vmul.f32 1.442695, %v730_v37 }
 0x389   :  { %v790_v4 = vadd.f32 %v789_v62, %v788_v26 }
 0x38a   :  { %v795_v9 = vsel %vm667_vm4, %v781_v25, 0.0 }
 0x38b   :  { %v796_v10 = vrot.slane %v795_v9, 4  ;;  %v791_v29 = vrot.slane %v790_v4, 2  ;;  %v1240_v12 = vpop.eup %1239 }
 0x38c   :  { %v1572_v47 = vmul.f32 %v1240_v12, %v763_v41 }
 0x38d   :  { %v797_v21 = vadd.f32 %v796_v10, %v795_v9  ;;  %v792_v13 = vadd.f32 %v791_v29, %v790_v4 }
 0x38e   :  { %v809_v54 = vsel %vm667_vm4, %v1572_v47, 0.0 }
 0x38f   :  { %v798_v22 = vrot.slane %v797_v21, 2  ;;  %v793_v27 = vrot.slane %v792_v13, 1  ;;  %v1242_v48 = vpop.eup %1241  ;;  %v810_v26 = vrot.slane %v809_v54, 4 }
 0x390   :  { %v1577_v55 = vmul.f32 %v1242_v48, %v767_v49 }
 0x391   :  { %v799_v33 = vadd.f32 %v798_v22, %v797_v21  ;;  %v794_v15 = vadd.f32 %v793_v27, %v792_v13  ;;  %v811_v63 = vadd.f32 %v810_v26, %v809_v54 }
 0x392   :  { %v823_v30 = vsel %vm667_vm4, %v1577_v55, 0.0 }
 0x393   :  { %v800_v35 = vrot.slane %v799_v33, 1  ;;  %v844_v36 = vadd.f32 1e-10, %v794_v15  ;;  %v824_v23 = vrot.slane %v823_v30, 4  ;;  %v812_v2 = vrot.slane %v811_v63, 2 }
 0x395   :  { %v801_v40 = vadd.f32 %v800_v35, %v799_v33  ;;  %1243 = vrcp.f32 %v844_v36  ;;  %v825_v4 = vadd.f32 %v824_v23, %v823_v30  ;;  %v813_v8 = vadd.f32 %v812_v2, %v811_v63  ;;  %v771_v2 = vpop.permute.xlu0 %770 }
 0x397   :  { %v845_v42 = vadd.f32 1e-10, %v801_v40  ;;  %v826_v11 = vrot.slane %v825_v4, 2  ;;  %v814_v31 = vrot.slane %v813_v8, 1 }
 0x399   :  { %1245 = vrcp.f32 %v845_v42  ;;  %v827_v32 = vadd.f32 %v826_v11, %v825_v4  ;;  %v815_v42 = vadd.f32 %v814_v31, %v813_v8 }
 0x39a   :  { %1247 = vpow2.f32 %v736_v50 }
 0x39b   :  { %1249 = vpow2.f32 %v740_v20  ;;  %v828_v43 = vrot.slane %v827_v32, 1  ;;  %v847_v20 = vadd.f32 1e-10, %v815_v42 }
 0x39c   :  { %1251 = vpow2.f32 %v744_v44 }
 0x39d   :  { %v829_v37 = vadd.f32 %v828_v43, %v827_v32 }
 0x39f   :  { %v1244_v58 = vpop.eup %1243 }
 0x3a0   :  { %v860_v24 = vmul.f32 %v1244_v58, %v780_v57 }
 0x3a2   :  { %870 = vperm.xlu1 %1206, %v860_v24  }
 0x3a3   :  { %v1246_v61 = vpop.eup %1245 }
 0x3a4   :  { %v861_v62 = vmul.f32 %v1246_v61, %v781_v25  ;;  %v1248_v57 = vpop.eup %1247 }
 0x3a5   :  { %v1250_v14 = vpop.eup %1249 }
 0x3a6   :  { %875 = vperm.xlu0 %1207, %v861_v62   ;;  %v651_v0 = vpop.xlane.xlu1 %650  ;;  %v1252_v15 = vpop.eup %1251  ;;  %v849_v62 = vadd.f32 1e-10, %v829_v37 }
 0x3a7   :  { %v666_v1 = vadd.f32 %v1544_v19, %v651_v0 }
 0x3a9   :  { %v717_v51 = vsel %vm667_vm4, %v666_v1, -inf }
 0x3aa   :  { %v718_v9 = vrot.slane %v717_v51, 4  ;;  %v761_v10 = vpop.permute.xlu1 %760 }
 0x3ab   :  { %v782_v29 = vmul.f32 %v1248_v57, %v761_v10 }
 0x3ac   :  { %v719_v5 = vmax.f32 %v717_v51, %v718_v9 }
 0x3ad   :  { %v802_v25 = vsel %vm667_vm4, %v782_v29, 0.0 }
 0x3ae   :  { %v720_v21 = vrot.slane %v719_v5, 2  ;;  %v803_v13 = vrot.slane %v802_v25, 4  ;;  %v765_v22 = vpop.permute.xlu1 %764 }
 0x3af   :  { %v784_v27 = vmul.f32 %v1250_v14, %v765_v22 }
 0x3b0   :  { %v721_v19 = vmax.f32 %v719_v5, %v720_v21  ;;  %v804_v28 = vadd.f32 %v803_v13, %v802_v25 }
 0x3b1   :  { %v816_v33 = vsel %vm667_vm4, %v784_v27, 0.0 }
 0x3b2   :  { %v722_v35 = vrot.slane %v721_v19, 1  ;;  %v805_v36 = vrot.slane %v804_v28, 2  ;;  %v817_v16 = vrot.slane %v816_v33, 4  ;;  %v769_v38 = vpop.permute.xlu1 %768 }
 0x3b3   :  { %v786_v39 = vmul.f32 %v1252_v15, %v769_v38 }
 0x3b4   :  { %v723_v40 = vmax.f32 %v721_v19, %v722_v35  ;;  %v806_v41 = vadd.f32 %v805_v36, %v804_v28  ;;  %v818_v12 = vadd.f32 %v817_v16, %v816_v33 }
 0x3b5   :  { %v830_v45 = vsel %vm667_vm4, %v786_v39, 0.0 }
 0x3b6   :  { %v731_v46 = vsub.f32 %v666_v1, %v723_v40  ;;  %v807_v48 = vrot.slane %v806_v41, 1  ;;  %v819_v49 = vrot.slane %v818_v12, 2  ;;  %v831_v50 = vrot.slane %v830_v45, 4 }
 0x3b8   :  { %v746_v52 = vmul.f32 1.442695, %v731_v46  ;;  %v808_v53 = vadd.f32 %v807_v48, %v806_v41  ;;  %v820_v54 = vadd.f32 %v819_v49, %v818_v12  ;;  %v832_v58 = vadd.f32 %v831_v50, %v830_v45 }
 0x3ba   :  { %1253 = vpow2.f32 %v746_v52  ;;  %v846_v24 = vadd.f32 1e-10, %v808_v53  ;;  %v821_v26 = vrot.slane %v820_v54, 1  ;;  %v833_v30 = vrot.slane %v832_v58, 2 }
 0x3bc   :  { %1255 = vrcp.f32 %v846_v24  ;;  %v822_v61 = vadd.f32 %v821_v26, %v820_v54  ;;  %v834_v44 = vadd.f32 %v833_v30, %v832_v58 }
 0x3bd   :  { %1257 = vrcp.f32 %v847_v20 }
 0x3be   :  { %v848_v63 = vadd.f32 1e-10, %v822_v61  ;;  %v835_v23 = vrot.slane %v834_v44, 1 }
 0x3c0   :  { %1259 = vrcp.f32 %v848_v63  ;;  %v836_v0 = vadd.f32 %v835_v23, %v834_v44 }
 0x3c1   :  { %1261 = vrcp.f32 %v849_v62 }
 0x3c2   :  { %v850_v1 = vadd.f32 1e-10, %v836_v0 }
 0x3c4   :  { %v1254_v4 = vpop.eup %1253  ;;  %1263 = vrcp.f32 %v850_v1 }
 0x3c5   :  { %v787_v51 = vmul.f32 %v1254_v4, %v771_v2 }
 0x3c6   :  { %v1256_v57 = vpop.eup %1255 }
 0x3c7   :  { %v862_v9 = vmul.f32 %v1256_v57, %v782_v29  ;;  %v837_v10 = vsel %vm667_vm4, %v787_v51, 0.0  ;;  %v1258_v5 = vpop.eup %1257 }
 0x3c8   :  { %v838_v8 = vrot.slane %v837_v10, 4  ;;  %v863_v14 = vmul.f32 %v1258_v5, %v1572_v47  ;;  %v1217_v47 = vld [vmem:[%s1632_s11] sm:$0xff]  }
 0x3c9   :  { %880 = vperm.xlu1 %1206, %v862_v9   ;;  %1185 = vmatpush3.bf16.msra.mxu1 %v1217_v47 }
 0x3ca   :  { %v1260_v11 = vpop.eup %1259  ;;  %v839_v25 = vadd.f32 %v838_v8, %v837_v10  ;;  %1186 = vmatprep.subr.bf16.mxu1 %v1270_v34 }
 0x3cb   :  { %v864_v21 = vmul.f32 %v1260_v11, %v784_v27  ;;  %v1262_v13 = vpop.eup %1261  ;;  %v1218_v27 = vld [vmem:[%s1632_s11 + $0x8] sm:$0xff]  }
 0x3cc   :  { %v840_v22 = vrot.slane %v839_v25, 2  ;;  %v865_v31 = vmul.f32 %v1262_v13, %v1577_v55 }
 0x3cd   :  { %885 = vperm.xlu1 %1206, %v863_v14   ;;  %890 = vperm.xlu0 %1207, %v864_v21  }
 0x3ce   :  { %v1264_v19 = vpop.eup %1263  ;;  %v841_v28 = vadd.f32 %v840_v22, %v839_v25  ;;  %1187 = vmatpush3.bf16.msra.mxu1 %v1218_v27 }
 0x3cf   :  { %v866_v32 = vmul.f32 %v1264_v19, %v786_v39 }
 0x3d0   :  { %v842_v29 = vrot.slane %v841_v28, 1 }
 0x3d1   :  { %895 = vperm.xlu1 %1206, %v865_v31   ;;  %900 = vperm.xlu0 %1207, %v866_v32  }
 0x3d2   :  { %v843_v33 = vadd.f32 %v842_v29, %v841_v28 }
 0x3d4   :  { %v851_v15 = vadd.f32 1e-10, %v843_v33 }
 0x3d6   :  { %1265 = vrcp.f32 %v851_v15 }
 0x3e0   :  { %v1266_v35 = vpop.eup %1265 }
 0x3e1   :  { %v867_v36 = vmul.f32 %v1266_v35, %v787_v51 }
 0x3e3   :  { %905 = vperm.xlu1 %1206, %v867_v36  }
 0x421   :  { %v871_v16 = vpop.permute.xlu1 %870 }
 0x422   :  { %v908_v39 = vmul.f32 %v871_v16, %v1483_v56 }
 0x424   :  { %v916_v42 = vsel %vm93_vm0, %v908_v39, 0.0 }
 0x425   :  { %v876_v55 = vpop.permute.xlu0 %875 }
 0x426   :  { %v909_v38 = vmul.f32 %v876_v55, %v1488_v60  ;;  %v917_v60 = vrot.slane %v916_v42, 4 }
 0x428   :  { %v923_v41 = vsel %vm93_vm0, %v909_v38, 0.0  ;;  %v918_v30 = vadd.f32 %v917_v60, %v916_v42 }
 0x429   :  { %v924_v45 = vrot.slane %v923_v41, 4 }
 0x42a   :  { %v919_v1 = vrot.slane %v918_v30, 2 }
 0x42b   :  { %v925_v53 = vadd.f32 %v924_v45, %v923_v41 }
 0x42c   :  { %v920_v10 = vadd.f32 %v919_v1, %v918_v30 }
 0x42d   :  { %v926_v44 = vrot.slane %v925_v53, 2 }
 0x42e   :  { %v921_v21 = vrot.slane %v920_v10, 1 }
 0x42f   :  { %v927_v51 = vadd.f32 %v926_v44, %v925_v53 }
 0x430   :  { %v922_v29 = vadd.f32 %v921_v21, %v920_v10 }
 0x431   :  { %v928_v8 = vrot.slane %v927_v51, 1 }
 0x432   :  { %v972_v39 = vpack.c.bf16 %v922_v29, %v922_v29 }
 0x433   :  { %v929_v19 = vadd.f32 %v928_v8, %v927_v51 }
 0x435   :  { %v973_v47 = vpack.c.bf16 %v929_v19, %v929_v19 }
 0x437   :  { %v1000_v42 = vunpack.c.l.b16 %v973_v47 }
 0x448   :  { %v881_v40 = vpop.permute.xlu1 %880 }
 0x449   :  { %v910_v12 = vmul.f32 %v881_v40, %v1486_v59 }
 0x44b   :  { %v930_v43 = vsel %vm93_vm0, %v910_v12, 0.0 }
 0x44c   :  { %v891_v46 = vpop.permute.xlu0 %890  ;;  %v886_v48 = vpop.permute.xlu1 %885  ;;  %v931_v34 = vrot.slane %v930_v43, 4 }
 0x44d   :  { %v912_v49 = vmul.f32 %v891_v46, %v1494_v6  ;;  %v911_v50 = vmul.f32 %v886_v48, %v1492_v3 }
 0x44e   :  { %v932_v20 = vadd.f32 %v931_v34, %v930_v43  ;;  %v999_v34 = vunpack.c.l.b16 %v972_v39 }
 0x44f   :  { %v944_v56 = vsel %vm93_vm0, %v912_v49, 0.0  ;;  %v937_v52 = vsel %vm93_vm0, %v911_v50, 0.0 }
 0x450   :  { %v938_v54 = vrot.slane %v937_v52, 4  ;;  %v901_v59 = vpop.permute.xlu0 %900  ;;  %v896_v58 = vpop.permute.xlu1 %895  ;;  %v945_v37 = vrot.slane %v944_v56, 4  ;;  %v933_v62 = vrot.slane %v932_v20, 2  ;;  %v1008_v60 = vsel %vm1007_vm5, %v1000_v42, %v999_v34 }
 0x451   :  { %v914_v24 = vmul.f32 %v901_v59, %v1509_v17  ;;  %v913_v26 = vmul.f32 %v896_v58, %v1499_v18 }
 0x452   :  { %v939_v61 = vadd.f32 %v938_v54, %v937_v52  ;;  %v946_v63 = vadd.f32 %v945_v37, %v944_v56  ;;  %v934_v57 = vadd.f32 %v933_v62, %v932_v20 }
 0x453   :  { %v958_v6 = vsel %vm93_vm0, %v914_v24, 0.0  ;;  %v951_v3 = vsel %vm93_vm0, %v913_v26, 0.0 }
 0x454   :  { %v959_v23 = vrot.slane %v958_v6, 4  ;;  %v952_v0 = vrot.slane %v951_v3, 4  ;;  %v940_v2 = vrot.slane %v939_v61, 2  ;;  %v947_v9 = vrot.slane %v946_v63, 2 }
 0x455   :  { %v935_v11 = vrot.slane %v934_v57, 1 }
 0x456   :  { %v953_v4 = vadd.f32 %v952_v0, %v951_v3  ;;  %v960_v17 = vadd.f32 %v959_v23, %v958_v6  ;;  %v941_v18 = vadd.f32 %v940_v2, %v939_v61  ;;  %v948_v25 = vadd.f32 %v947_v9, %v946_v63  ;;  %v1109_v63 = vld [vmem:[%s1633_s12] ss:$0 sm:$0xff] }
 0x457   :  { %v936_v28 = vadd.f32 %v935_v11, %v934_v57 }
 0x458   :  { %v954_v5 = vrot.slane %v953_v4, 2  ;;  %v961_v14 = vrot.slane %v960_v17, 2  ;;  %v942_v13 = vrot.slane %v941_v18, 1  ;;  %v949_v31 = vrot.slane %v948_v25, 1 }
 0x459   :  { %v974_v27 = vpack.c.bf16 %v936_v28, %v936_v28 }
 0x45a   :  { %v955_v22 = vadd.f32 %v954_v5, %v953_v4  ;;  %v962_v32 = vadd.f32 %v961_v14, %v960_v17  ;;  %v943_v33 = vadd.f32 %v942_v13, %v941_v18  ;;  %v950_v55 = vadd.f32 %v949_v31, %v948_v25 }
 0x45b   :  { %v1001_v45 = vunpack.c.l.b16 %v974_v27 }
 0x45c   :  { %v956_v15 = vrot.slane %v955_v22, 1  ;;  %v963_v16 = vrot.slane %v962_v32, 1  ;;  %v975_v40 = vpack.c.bf16 %v943_v33, %v943_v33  ;;  %v976_v46 = vpack.c.bf16 %v950_v55, %v950_v55 }
 0x45d   :  { %v1010_v52 = vsel %vm1009_vm6, %v1001_v45, %v1008_v60 }
 0x45e   :  { %v957_v41 = vadd.f32 %v956_v15, %v955_v22  ;;  %v964_v48 = vadd.f32 %v963_v16, %v962_v32  ;;  %v1002_v49 = vunpack.c.l.b16 %v975_v40  ;;  %v1003_v53 = vunpack.c.l.b16 %v976_v46 }
 0x460   :  { %v978_v54 = vpack.c.bf16 %v964_v48, %v964_v48  ;;  %v1012_v59 = vsel %vm1011_vm7, %v1002_v49, %v1010_v52 }
 0x461   :  { %v1014_v26 = vsel %vm1013_vm8, %v1003_v53, %v1012_v59 }
 0x462   :  { %v906_v35 = vpop.permute.xlu1 %905  ;;  %v1005_v24 = vunpack.c.l.b16 %v978_v54 }
 0x463   :  { %v915_v36 = vmul.f32 %v906_v35, %v1502_v7  ;;  %v977_v7 = vpack.c.bf16 %v957_v41, %v957_v41 }
 0x465   :  { %v965_v38 = vsel %vm93_vm0, %v915_v36, 0.0  ;;  %v1004_v58 = vunpack.c.l.b16 %v977_v7 }
 0x466   :  { %v966_v12 = vrot.slane %v965_v38, 4 }
 0x467   :  { %v1016_v30 = vsel %vm1015_vm9, %v1004_v58, %v1014_v26 }
 0x468   :  { %v967_v43 = vadd.f32 %v966_v12, %v965_v38  ;;  %v1018_v3 = vsel %vm1017_vm10, %v1005_v24, %v1016_v30 }
 0x46a   :  { %v968_v50 = vrot.slane %v967_v43, 2 }
 0x46c   :  { %v969_v56 = vadd.f32 %v968_v50, %v967_v43 }
 0x46e   :  { %v970_v20 = vrot.slane %v969_v56, 1 }
 0x470   :  { %v971_v37 = vadd.f32 %v970_v20, %v969_v56 }
 0x472   :  { %v979_v61 = vpack.c.bf16 %v971_v37, %v971_v37 }
 0x474   :  { %v1006_v6 = vunpack.c.l.b16 %v979_v61 }
 0x476   :  { %v1020_v44 = vsel %vm1019_vm11, %v1006_v6, %v1018_v3 }
 0x477   :  { %v1021_v62 = vpack.c.b16 %v1020_v44, %v1020_v44 }
 0x479   :  { %1189 = vmatmul.mubr.msk.bf16.vlgmr.msra.gmra.mrb[12].mxu1 %vm93_vm0, %v1021_v62 }
 0x54c   :  { %v1071_v23 = vpop.f32.mrb[12].mxu1 }
 0x54d   :  { %v1072_v0 = vadd.f32 %v1109_v63, %v1071_v23  ;;  %v1190_v1 = vpop.f32.mrb[13].mxu1 }
 0x54e   :  { %v1074_v2 = vpop.f32.mrb[14].mxu1 }
 0x54f   :  { %1267 = vtanh.f32 %v1072_v0  ;;  %v1191_v4 = vpop.f32.mrb[15].mxu1 }
 0x559   :  { %v1268_v51 = vpop.eup %1267 }
 0x55a   :  { %1078 = vst.msk [vmem:[%s1634_s13] sm:$0xff] %vm93_vm0, %v1268_v51 }

</bundles_post_ra>
